<compile_context>
chip_gen: v5e
topology: v5e:2x2
jax: 0.10.0
libtpu: 0.0.40
codegen_flags: <defaults>
</compile_context>

<pallas_src>
import functools
import math

import jax
import jax.numpy as jnp
from jax import lax
from jax.experimental import pallas as pl
from jax.experimental.pallas import tpu as pltpu


# ----------------------------------------------------------------------------
# In-kernel helpers
# ----------------------------------------------------------------------------
def _layernorm(x, gamma, beta, eps=1e-5):
    # x: (rows, D) f32 ; gamma/beta: (1, D) f32
    mean = jnp.mean(x, axis=-1, keepdims=True)
    var = jnp.mean((x - mean) ** 2, axis=-1, keepdims=True)
    return (x - mean) * lax.rsqrt(var + eps) * gamma + beta


# ----------------------------------------------------------------------------
# Fused kernel: one grid step == one transformer layer on one batch tile.
# ----------------------------------------------------------------------------
def fused_bottleneck_kernel(
        x_ref,                                                 # (BB, N, D) input
        g1_ref, be1_ref, wq_ref, wk_ref, wv_ref, wo_ref, bo_ref,
        g2_ref, be2_ref, w1_ref, b1_ref, w2_ref, b2_ref,
        fg_ref, fb_ref,                                        # final LayerNorm
        o_ref,                                                 # (BB, N, D) output
        acc_ref,                                               # VMEM (BN, D) f32 residual carry
        attn_ref,                                              # VMEM (BN, D) f32 per-head slab
        *, heads):
    layer = pl.program_id(1)
    BB, N, D = x_ref.shape
    BN = BB * N
    dh = D // heads

    # Load the activation into the VMEM carry at the first layer of this tile.
    @pl.when(layer == 0)
    def _load():
        acc_ref[...] = x_ref[...].astype(jnp.float32).reshape(BN, D)

    x = acc_ref[...]                                           # (BN, D) f32

    # ---------------- Attention block ----------------
    xn = _layernorm(x, g1_ref[0], be1_ref[0]).astype(jnp.bfloat16)
    # 1/sqrt(dh) is folded into wq at parameter-prep time.
    q = jnp.dot(xn, wq_ref[0], preferred_element_type=jnp.float32)   # (BN, D)
    k = jnp.dot(xn, wk_ref[0], preferred_element_type=jnp.float32)
    v = jnp.dot(xn, wv_ref[0], preferred_element_type=jnp.float32)

    # TODO(synk): at real N/heads, flash-tile over KV and use lax.fori_loop
    # (static unroll does not bound live ranges at heads >= 8).
    for h in range(heads):
        lo = h * dh
        q_h = q[:, lo:lo + dh].reshape(BB, N, dh).astype(jnp.bfloat16)
        k_h = k[:, lo:lo + dh].reshape(BB, N, dh).astype(jnp.bfloat16)
        v_h = v[:, lo:lo + dh].reshape(BB, N, dh).astype(jnp.bfloat16)

        dots = jnp.einsum('bqd,bkd->bqk', q_h, k_h,
                          preferred_element_type=jnp.float32)        # (BB, N, N)
        m = jnp.max(dots, axis=-1, keepdims=True)
        e = jnp.exp(dots - m)                                        # f32 EUP
        p = e * pl.reciprocal(jnp.sum(e, axis=-1, keepdims=True), approx=True)
        o_h = jnp.einsum('bqk,bkd->bqd', p.astype(jnp.bfloat16), v_h,
                         preferred_element_type=jnp.float32)         # (BB, N, dh)
        # concat_h(o_h): write this head's columns into the (BN, D) slab.
        attn_ref[:, lo:lo + dh] = o_h.reshape(BN, dh)

    # Single K=D output projection + residual + bias.
    x = x + bo_ref[0] + jnp.dot(attn_ref[...].astype(jnp.bfloat16), wo_ref[0],
                                preferred_element_type=jnp.float32)

    # ---------------- Feed-forward block ----------------
    xn2 = _layernorm(x, g2_ref[0], be2_ref[0])
    hdn = jnp.dot(xn2.astype(jnp.bfloat16), w1_ref[0],
                  preferred_element_type=jnp.float32) + b1_ref[0]    # (BN, Hp)
    # exact GELU (PyTorch nn.GELU default), f32 on the VPU/EUP
    hdn = 0.5 * hdn * (1.0 + lax.erf(hdn * (1.0 / math.sqrt(2.0))))
    x = jnp.dot(hdn.astype(jnp.bfloat16), w2_ref[0],
                preferred_element_type=jnp.float32) + b2_ref[0] + x  # (BN, D)

    acc_ref[...] = x                                           # carry to next layer

    # Final LayerNorm + store only after the last layer of this batch tile.
    @pl.when(layer == pl.num_programs(1) - 1)
    def _store():
        y = _layernorm(x, fg_ref[...], fb_ref[...])
        o_ref[...] = y.reshape(BB, N, D).astype(o_ref.dtype)


# ----------------------------------------------------------------------------
# Host-side parameter prep + wrapper
# ----------------------------------------------------------------------------
_WEIGHT_KEYS = ('ln1_g', 'ln1_b', 'wq', 'wk', 'wv', 'wo', 'bo',
                'ln2_g', 'ln2_b', 'w1', 'b1', 'w2', 'b2')


def prepare_params(params, heads):
    """Split qkv, fold 1/sqrt(dh) into wq, pad mlp_hidden to 128, cast MXU
    weights to bf16 (biases / LN params stay f32)."""
    depth, dim, _ = params['wqkv'].shape
    dh = dim // heads
    scale = dh ** (-0.5)
    wqkv = params['wqkv']
    hid = params['w1'].shape[-1]
    hid_p = ((hid + 127) // 128) * 128
    pad = hid_p - hid
    return {
        'ln1_g': params['ln1_g'], 'ln1_b': params['ln1_b'],
        'wq': (wqkv[:, :, :dim] * scale).astype(jnp.bfloat16),
        'wk': wqkv[:, :, dim:2 * dim].astype(jnp.bfloat16),
        'wv': wqkv[:, :, 2 * dim:].astype(jnp.bfloat16),
        'wo': params['wo'].astype(jnp.bfloat16),
        'bo': params['bo'],
        'ln2_g': params['ln2_g'], 'ln2_b': params['ln2_b'],
        'w1': jnp.pad(params['w1'], ((0, 0), (0, 0), (0, pad))).astype(jnp.bfloat16),
        'b1': jnp.pad(params['b1'], ((0, 0), (0, 0), (0, pad))),
        'w2': jnp.pad(params['w2'], ((0, 0), (0, pad), (0, 0))).astype(jnp.bfloat16),
        'b2': params['b2'],
        'fg': params['fg'], 'fb': params['fb'],
    }


def bottleneck_forward(x, params, heads, *, batch_block=None):
    B, N, D = x.shape
    assert D % heads == 0, "dim must be divisible by heads"
    # TODO(synk): pad N to a multiple of 8 sublanes at real sizes.
    depth = params['wqkv'].shape[0]

    if batch_block is None:
        # >= 2 batch tiles when possible so the "parallel" axis spans both
        # TensorCores on v7x; fall back to a single tile otherwise.
        batch_block = B // 2 if (B >= 2 and B % 2 == 0) else B
    BB = min(batch_block, B)
    assert B % BB == 0, "batch must divide evenly into batch tiles"

    prep = prepare_params(params, heads)
    hid_p = prep['w1'].shape[-1]

    def wspec(arr):
        nd = arr.ndim

        def imap(b, l):
            # one layer slice per depth-grid step; prefetched while prev layer runs
            return (l,) + (0,) * (nd - 1)

        return pl.BlockSpec((1,) + tuple(arr.shape[1:]), imap)

    in_specs = [pl.BlockSpec((BB, N, D), lambda b, l: (b, 0, 0))]
    in_specs += [wspec(prep[k]) for k in _WEIGHT_KEYS]
    in_specs += [pl.BlockSpec((1, D), lambda b, l: (0, 0)),
                 pl.BlockSpec((1, D), lambda b, l: (0, 0))]

    # ---- explicit VMEM budget (double-buffered weights + activations) ----
    per_layer_w = sum((prep[k].size // depth) * prep[k].dtype.itemsize
                      for k in _WEIGHT_KEYS)
    io_bytes = 2 * BB * N * D * x.dtype.itemsize            # in + out tile
    scratch_bytes = 2 * BB * N * D * 4                       # acc + attn slabs (f32)
    act_bytes = (3 * BB * N * D + BB * N * hid_p + BB * N * N) * 4
    need = 2 * per_layer_w + 2 * io_bytes + scratch_bytes + act_bytes
    vmem_limit = int(min(max(2 * need, 32 * 1024 * 1024), 64 * 1024 * 1024))

    return pl.pallas_call(
        functools.partial(fused_bottleneck_kernel, heads=heads),
        out_shape=jax.ShapeDtypeStruct((B, N, D), x.dtype),
        grid_spec=pltpu.PrefetchScalarGridSpec(
            num_scalar_prefetch=0,
            grid=(B // BB, depth),            # (batch tiles, layers)
            in_specs=in_specs,
            out_specs=pl.BlockSpec((BB, N, D), lambda b, l: (b, 0, 0)),
            scratch_shapes=[pltpu.VMEM((BB * N, D), jnp.float32),   # residual carry
                            pltpu.VMEM((BB * N, D), jnp.float32)],  # attn head slab
        ),
        compiler_params=pltpu.CompilerParams(
            dimension_semantics=("parallel", "arbitrary"),
            vmem_limit_bytes=vmem_limit),
    )(x, *[prep[k] for k in _WEIGHT_KEYS], prep['fg'], prep['fb'])


# ----------------------------------------------------------------------------
# Deterministic parameter construction (stacked along a leading depth axis),
# mirroring the PyTorch module's parameter shapes (f32).
# ----------------------------------------------------------------------------
def init_params(key, dim, depth, mlp_ratio):
    mlp_hidden = int(dim * mlp_ratio)
    keys = jax.random.split(key, 5 * depth)

    def nrm(k, shape):
        return jax.random.normal(k, shape, jnp.float32) * 0.05

    return {
        'ln1_g': jnp.ones((depth, 1, dim), jnp.float32),
        'ln1_b': jnp.zeros((depth, 1, dim), jnp.float32),
        'wqkv': jnp.stack([nrm(keys[5 * i + 0], (dim, 3 * dim)) for i in range(depth)]),
        'wo':   jnp.stack([nrm(keys[5 * i + 1], (dim, dim)) for i in range(depth)]),
        'bo':   jnp.stack([nrm(keys[5 * i + 2], (1, dim)) for i in range(depth)]),
        'ln2_g': jnp.ones((depth, 1, dim), jnp.float32),
        'ln2_b': jnp.zeros((depth, 1, dim), jnp.float32),
        'w1':   jnp.stack([nrm(keys[5 * i + 3], (dim, mlp_hidden)) for i in range(depth)]),
        'b1':   jnp.zeros((depth, 1, mlp_hidden), jnp.float32),
        'w2':   jnp.stack([nrm(keys[5 * i + 4], (mlp_hidden, dim)) for i in range(depth)]),
        'b2':   jnp.zeros((depth, 1, dim), jnp.float32),
        'fg':   jnp.ones((1, dim), jnp.float32),
        'fb':   jnp.zeros((1, dim), jnp.float32),
    }


# ----------------------------------------------------------------------------
# Pure-JAX f32 reference (sanity check, faithful to the PyTorch module)
# ----------------------------------------------------------------------------
def _ref_ln(x, g, b, eps=1e-5):
    m = jnp.mean(x, -1, keepdims=True)
    v = jnp.mean((x - m) ** 2, -1, keepdims=True)
    return (x - m) / jnp.sqrt(v + eps) * g + b


def ref_forward(x, p, heads):
    B, N, D = x.shape
    depth = p['wqkv'].shape[0]
    dh = D // heads
    for i in range(depth):
        xn = _ref_ln(x, p['ln1_g'][i], p['ln1_b'][i])
        qkv = xn @ p['wqkv'][i]
        q, k, v = jnp.split(qkv, 3, axis=-1)
        q = q.reshape(B, N, heads, dh).transpose(0, 2, 1, 3)
        k = k.reshape(B, N, heads, dh).transpose(0, 2, 1, 3)
        v = v.reshape(B, N, heads, dh).transpose(0, 2, 1, 3)
        dots = (q @ k.transpose(0, 1, 3, 2)) * dh ** -0.5
        attn = jax.nn.softmax(dots, axis=-1)
        out = (attn @ v).transpose(0, 2, 1, 3).reshape(B, N, D)
        x = out @ p['wo'][i] + p['bo'][i] + x
        xn = _ref_ln(x, p['ln2_g'][i], p['ln2_b'][i])
        h = xn @ p['w1'][i] + p['b1'][i]
        h = 0.5 * h * (1.0 + lax.erf(h / math.sqrt(2.0)))
        x = h @ p['w2'][i] + p['b2'][i] + x
    return _ref_ln(x, p['fg'], p['fb'])


# ----------------------------------------------------------------------------
if __name__ == "__main__":
    B, N, D = 2, 8, 32
    depth, heads, mlp_ratio = 2, 4, 0.4

    key = jax.random.PRNGKey(0)
    kx, kp = jax.random.split(key)
    x = jax.random.normal(kx, (B, N, D), jnp.float32)
    params = init_params(kp, D, depth, mlp_ratio)

    out = jax.block_until_ready(bottleneck_forward(x, params, heads))
    ref = ref_forward(x, params, heads)

    assert out.shape == (B, N, D)
    err = float(jnp.max(jnp.abs(out - ref)))
    # bf16 MXU operands + approx reciprocal -> looser tolerance vs f32 reference.
    assert jnp.allclose(out, ref, atol=5e-2, rtol=5e-2), err

    print("KERNEL_OK")
</pallas_src>

<mosaic_0001>
module attributes {stable_mosaic.version = 11 : i64} {
  func.func @fused_bottleneck_kernel(%arg0: i32, %arg1: i32, %arg2: memref<1x8x32xf32, #tpu.memory_space<vmem>>, %arg3: memref<1x1x32xf32, #tpu.memory_space<vmem>>, %arg4: memref<1x1x32xf32, #tpu.memory_space<vmem>>, %arg5: memref<1x32x32xbf16, #tpu.memory_space<vmem>>, %arg6: memref<1x32x32xbf16, #tpu.memory_space<vmem>>, %arg7: memref<1x32x32xbf16, #tpu.memory_space<vmem>>, %arg8: memref<1x32x32xbf16, #tpu.memory_space<vmem>>, %arg9: memref<1x1x32xf32, #tpu.memory_space<vmem>>, %arg10: memref<1x1x32xf32, #tpu.memory_space<vmem>>, %arg11: memref<1x1x32xf32, #tpu.memory_space<vmem>>, %arg12: memref<1x32x128xbf16, #tpu.memory_space<vmem>>, %arg13: memref<1x1x128xf32, #tpu.memory_space<vmem>>, %arg14: memref<1x128x32xbf16, #tpu.memory_space<vmem>>, %arg15: memref<1x1x32xf32, #tpu.memory_space<vmem>>, %arg16: memref<1x32xf32, #tpu.memory_space<vmem>>, %arg17: memref<1x32xf32, #tpu.memory_space<vmem>>, %arg18: memref<1x8x32xf32, #tpu.memory_space<vmem>>, %arg19: memref<8x32xf32, #tpu.memory_space<vmem>>, %arg20: memref<8x32xf32, #tpu.memory_space<vmem>>) attributes {dimension_semantics = [#tpu.dimension_semantics<parallel>, #tpu.dimension_semantics<arbitrary>], iteration_bounds = array<i64: 2, 2>, scalar_prefetch = 0 : i64, scratch_operands = 2 : i64, tpu.core_type = #tpu.core_type<tc>, window_params = [{transform_indices = @transform_0, window_bounds = array<i64: 1, 8, 32>}, {transform_indices = @transform_1, window_bounds = array<i64: 1, 1, 32>}, {transform_indices = @transform_2, window_bounds = array<i64: 1, 1, 32>}, {transform_indices = @transform_3, window_bounds = array<i64: 1, 32, 32>}, {transform_indices = @transform_4, window_bounds = array<i64: 1, 32, 32>}, {transform_indices = @transform_5, window_bounds = array<i64: 1, 32, 32>}, {transform_indices = @transform_6, window_bounds = array<i64: 1, 32, 32>}, {transform_indices = @transform_7, window_bounds = array<i64: 1, 1, 32>}, {transform_indices = @transform_8, window_bounds = array<i64: 1, 1, 32>}, {transform_indices = @transform_9, window_bounds = array<i64: 1, 1, 32>}, {transform_indices = @transform_10, window_bounds = array<i64: 1, 32, 128>}, {transform_indices = @transform_11, window_bounds = array<i64: 1, 1, 128>}, {transform_indices = @transform_12, window_bounds = array<i64: 1, 128, 32>}, {transform_indices = @transform_13, window_bounds = array<i64: 1, 1, 32>}, {pipeline_mode = #tpu.pipeline_mode<synchronous>, transform_indices = @transform_14, window_bounds = array<i64: 1, 32>}, {pipeline_mode = #tpu.pipeline_mode<synchronous>, transform_indices = @transform_15, window_bounds = array<i64: 1, 32>}, {transform_indices = @transform_16, window_bounds = array<i64: 1, 8, 32>}]} {
    %c0_i32 = arith.constant 0 : i32
    %0 = arith.cmpi eq, %arg1, %c0_i32 : i32
    %1 = arith.extui %0 : i1 to i32
    %c0_i32_0 = arith.constant 0 : i32
    %2 = arith.cmpi ne, %1, %c0_i32_0 : i32
    scf.if %2 {
      %c0_85 = arith.constant 0 : index
      %c0_86 = arith.constant 0 : index
      %c0_87 = arith.constant 0 : index
      %201 = vector.load %arg2[%c0_85, %c0_86, %c0_87] : memref<1x8x32xf32, #tpu.memory_space<vmem>>, vector<1x8x32xf32>
      %202 = vector.shape_cast %201 : vector<1x8x32xf32> to vector<8x32xf32>
      %c0_88 = arith.constant 0 : index
      %c0_89 = arith.constant 0 : index
      %203 = vector.load %arg19[%c0_88, %c0_89] : memref<8x32xf32, #tpu.memory_space<vmem>>, vector<8x32xf32>
      tpu.vector_store %arg19[%c0_88, %c0_89], %202 {strides = array<i32>} : memref<8x32xf32, #tpu.memory_space<vmem>>, vector<8x32xf32>,
    } else {
    }
    %c0 = arith.constant 0 : index
    %c0_1 = arith.constant 0 : index
    %3 = vector.load %arg19[%c0, %c0_1] : memref<8x32xf32, #tpu.memory_space<vmem>>, vector<8x32xf32>
    %c0_2 = arith.constant 0 : index
    %c0_3 = arith.constant 0 : index
    %c0_4 = arith.constant 0 : index
    %4 = vector.load %arg3[%c0_2, %c0_3, %c0_4] : memref<1x1x32xf32, #tpu.memory_space<vmem>>, vector<1x1x32xf32>
    %5 = vector.shape_cast %4 : vector<1x1x32xf32> to vector<1x32xf32>
    %c0_5 = arith.constant 0 : index
    %c0_6 = arith.constant 0 : index
    %c0_7 = arith.constant 0 : index
    %6 = vector.load %arg4[%c0_5, %c0_6, %c0_7] : memref<1x1x32xf32, #tpu.memory_space<vmem>>, vector<1x1x32xf32>
    %7 = vector.shape_cast %6 : vector<1x1x32xf32> to vector<1x32xf32>
    %cst = arith.constant dense<0.000000e+00> : vector<8xf32>
    %8 = vector.multi_reduction <add>, %3, %cst [1] : vector<8x32xf32> to vector<8xf32>
    %9 = vector.shape_cast %8 : vector<8xf32> to vector<8x1xf32>
    %cst_8 = arith.constant 3.200000e+01 : f32
    %10 = vector.broadcast %cst_8 : f32 to vector<8x1xf32>
    %11 = arith.divf %9, %10 : vector<8x1xf32>
    %12 = vector.broadcast %11 : vector<8x1xf32> to vector<8x32xf32>
    %13 = arith.subf %3, %12 : vector<8x32xf32>
    %14 = arith.mulf %13, %13 : vector<8x32xf32>
    %cst_9 = arith.constant dense<0.000000e+00> : vector<8xf32>
    %15 = vector.multi_reduction <add>, %14, %cst_9 [1] : vector<8x32xf32> to vector<8xf32>
    %16 = vector.shape_cast %15 : vector<8xf32> to vector<8x1xf32>
    %cst_10 = arith.constant 3.200000e+01 : f32
    %17 = vector.broadcast %cst_10 : f32 to vector<8x1xf32>
    %18 = arith.divf %16, %17 : vector<8x1xf32>
    %19 = vector.broadcast %11 : vector<8x1xf32> to vector<8x32xf32>
    %20 = arith.subf %3, %19 : vector<8x32xf32>
    %cst_11 = arith.constant 9.99999974E-6 : f32
    %21 = vector.broadcast %cst_11 : f32 to vector<8x1xf32>
    %22 = arith.addf %18, %21 : vector<8x1xf32>
    %23 = math.rsqrt %22 : vector<8x1xf32>
    %24 = vector.broadcast %23 : vector<8x1xf32> to vector<8x32xf32>
    %25 = arith.mulf %20, %24 : vector<8x32xf32>
    %26 = vector.broadcast %5 : vector<1x32xf32> to vector<8x32xf32>
    %27 = arith.mulf %25, %26 : vector<8x32xf32>
    %28 = vector.broadcast %7 : vector<1x32xf32> to vector<8x32xf32>
    %29 = arith.addf %27, %28 : vector<8x32xf32>
    %30 = arith.truncf %29 : vector<8x32xf32> to vector<8x32xbf16>
    %c0_12 = arith.constant 0 : index
    %c0_13 = arith.constant 0 : index
    %c0_14 = arith.constant 0 : index
    %31 = vector.load %arg5[%c0_12, %c0_13, %c0_14] : memref<1x32x32xbf16, #tpu.memory_space<vmem>>, vector<1x32x32xbf16>
    %32 = vector.shape_cast %31 : vector<1x32x32xbf16> to vector<32x32xbf16>
    %cst_15 = arith.constant dense<0.000000e+00> : vector<8x32xf32>
    %33 = tpu.matmul %30, %32, %cst_15 {dimension_numbers = #tpu.dot_dimension_numbers<[1], [0], [0], [1], [0, 0, 1, 1], [], []>} : vector<8x32xbf16>, vector<32x32xbf16>, vector<8x32xf32> -> vector<8x32xf32>
    %c0_16 = arith.constant 0 : index
    %c0_17 = arith.constant 0 : index
    %c0_18 = arith.constant 0 : index
    %34 = vector.load %arg6[%c0_16, %c0_17, %c0_18] : memref<1x32x32xbf16, #tpu.memory_space<vmem>>, vector<1x32x32xbf16>
    %35 = vector.shape_cast %34 : vector<1x32x32xbf16> to vector<32x32xbf16>
    %cst_19 = arith.constant dense<0.000000e+00> : vector<8x32xf32>
    %36 = tpu.matmul %30, %35, %cst_19 {dimension_numbers = #tpu.dot_dimension_numbers<[1], [0], [0], [1], [0, 0, 1, 1], [], []>} : vector<8x32xbf16>, vector<32x32xbf16>, vector<8x32xf32> -> vector<8x32xf32>
    %c0_20 = arith.constant 0 : index
    %c0_21 = arith.constant 0 : index
    %c0_22 = arith.constant 0 : index
    %37 = vector.load %arg7[%c0_20, %c0_21, %c0_22] : memref<1x32x32xbf16, #tpu.memory_space<vmem>>, vector<1x32x32xbf16>
    %38 = vector.shape_cast %37 : vector<1x32x32xbf16> to vector<32x32xbf16>
    %cst_23 = arith.constant dense<0.000000e+00> : vector<8x32xf32>
    %39 = tpu.matmul %30, %38, %cst_23 {dimension_numbers = #tpu.dot_dimension_numbers<[1], [0], [0], [1], [0, 0, 1, 1], [], []>} : vector<8x32xbf16>, vector<32x32xbf16>, vector<8x32xf32> -> vector<8x32xf32>
    %40 = vector.extract_strided_slice %33 {offsets = [0, 0], sizes = [8, 8], strides = [1, 1]} : vector<8x32xf32> to vector<8x8xf32>
    %41 = vector.shape_cast %40 : vector<8x8xf32> to vector<1x8x8xf32>
    %42 = arith.truncf %41 : vector<1x8x8xf32> to vector<1x8x8xbf16>
    %43 = vector.extract_strided_slice %36 {offsets = [0, 0], sizes = [8, 8], strides = [1, 1]} : vector<8x32xf32> to vector<8x8xf32>
    %44 = vector.shape_cast %43 : vector<8x8xf32> to vector<1x8x8xf32>
    %45 = arith.truncf %44 : vector<1x8x8xf32> to vector<1x8x8xbf16>
    %46 = vector.extract_strided_slice %39 {offsets = [0, 0], sizes = [8, 8], strides = [1, 1]} : vector<8x32xf32> to vector<8x8xf32>
    %47 = vector.shape_cast %46 : vector<8x8xf32> to vector<1x8x8xf32>
    %48 = arith.truncf %47 : vector<1x8x8xf32> to vector<1x8x8xbf16>
    "tpu.trace_start"() <{level = 10 : i32, message = "bqd,bkd->bqk"}> : () -> ()
    %cst_24 = arith.constant dense<0.000000e+00> : vector<1x8x8xf32>
    %49 = tpu.matmul %42, %45, %cst_24 {dimension_numbers = #tpu.dot_dimension_numbers<[2], [2], [1], [1], [0, 0, 0, 1, 1, 1], [0], [0]>} : vector<1x8x8xbf16>, vector<1x8x8xbf16>, vector<1x8x8xf32> -> vector<1x8x8xf32>
    "tpu.trace_stop"() : () -> ()
    %cst_25 = arith.constant dense<0xFF800000> : vector<1x8xf32>
    %50 = vector.multi_reduction <maximumf>, %49, %cst_25 [2] : vector<1x8x8xf32> to vector<1x8xf32>
    %51 = vector.shape_cast %50 : vector<1x8xf32> to vector<1x8x1xf32>
    %52 = vector.broadcast %51 : vector<1x8x1xf32> to vector<1x8x8xf32>
    %53 = arith.subf %49, %52 : vector<1x8x8xf32>
    %54 = math.exp %53 : vector<1x8x8xf32>
    %cst_26 = arith.constant dense<0.000000e+00> : vector<1x8xf32>
    %55 = vector.multi_reduction <add>, %54, %cst_26 [2] : vector<1x8x8xf32> to vector<1x8xf32>
    %56 = vector.shape_cast %55 : vector<1x8xf32> to vector<1x8x1xf32>
    %57 = tpu.reciprocal %56 {approx = true} : vector<1x8x1xf32> -> vector<1x8x1xf32>
    %58 = vector.broadcast %57 : vector<1x8x1xf32> to vector<1x8x8xf32>
    %59 = arith.mulf %54, %58 : vector<1x8x8xf32>
    %60 = arith.truncf %59 : vector<1x8x8xf32> to vector<1x8x8xbf16>
    "tpu.trace_start"() <{level = 10 : i32, message = "bqk,bkd->bqd"}> : () -> ()
    %cst_27 = arith.constant dense<0.000000e+00> : vector<1x8x8xf32>
    %61 = tpu.matmul %60, %48, %cst_27 {dimension_numbers = #tpu.dot_dimension_numbers<[2], [1], [1], [2], [0, 0, 0, 1, 1, 2], [0], [0]>} : vector<1x8x8xbf16>, vector<1x8x8xbf16>, vector<1x8x8xf32> -> vector<1x8x8xf32>
    "tpu.trace_stop"() : () -> ()
    %62 = vector.shape_cast %61 : vector<1x8x8xf32> to vector<8x8xf32>
    %c0_28 = arith.constant 0 : index
    %c0_29 = arith.constant 0 : index
    %63 = vector.load %arg20[%c0_28, %c0_29] : memref<8x32xf32, #tpu.memory_space<vmem>>, vector<8x8xf32>
    tpu.vector_store %arg20[%c0_28, %c0_29], %62 {strides = array<i32>} : memref<8x32xf32, #tpu.memory_space<vmem>>, vector<8x8xf32>,
    %64 = vector.extract_strided_slice %33 {offsets = [0, 8], sizes = [8, 8], strides = [1, 1]} : vector<8x32xf32> to vector<8x8xf32>
    %65 = vector.shape_cast %64 : vector<8x8xf32> to vector<1x8x8xf32>
    %66 = arith.truncf %65 : vector<1x8x8xf32> to vector<1x8x8xbf16>
    %67 = vector.extract_strided_slice %36 {offsets = [0, 8], sizes = [8, 8], strides = [1, 1]} : vector<8x32xf32> to vector<8x8xf32>
    %68 = vector.shape_cast %67 : vector<8x8xf32> to vector<1x8x8xf32>
    %69 = arith.truncf %68 : vector<1x8x8xf32> to vector<1x8x8xbf16>
    %70 = vector.extract_strided_slice %39 {offsets = [0, 8], sizes = [8, 8], strides = [1, 1]} : vector<8x32xf32> to vector<8x8xf32>
    %71 = vector.shape_cast %70 : vector<8x8xf32> to vector<1x8x8xf32>
    %72 = arith.truncf %71 : vector<1x8x8xf32> to vector<1x8x8xbf16>
    "tpu.trace_start"() <{level = 10 : i32, message = "bqd,bkd->bqk"}> : () -> ()
    %cst_30 = arith.constant dense<0.000000e+00> : vector<1x8x8xf32>
    %73 = tpu.matmul %66, %69, %cst_30 {dimension_numbers = #tpu.dot_dimension_numbers<[2], [2], [1], [1], [0, 0, 0, 1, 1, 1], [0], [0]>} : vector<1x8x8xbf16>, vector<1x8x8xbf16>, vector<1x8x8xf32> -> vector<1x8x8xf32>
    "tpu.trace_stop"() : () -> ()
    %cst_31 = arith.constant dense<0xFF800000> : vector<1x8xf32>
    %74 = vector.multi_reduction <maximumf>, %73, %cst_31 [2] : vector<1x8x8xf32> to vector<1x8xf32>
    %75 = vector.shape_cast %74 : vector<1x8xf32> to vector<1x8x1xf32>
    %76 = vector.broadcast %75 : vector<1x8x1xf32> to vector<1x8x8xf32>
    %77 = arith.subf %73, %76 : vector<1x8x8xf32>
    %78 = math.exp %77 : vector<1x8x8xf32>
    %cst_32 = arith.constant dense<0.000000e+00> : vector<1x8xf32>
    %79 = vector.multi_reduction <add>, %78, %cst_32 [2] : vector<1x8x8xf32> to vector<1x8xf32>
    %80 = vector.shape_cast %79 : vector<1x8xf32> to vector<1x8x1xf32>
    %81 = tpu.reciprocal %80 {approx = true} : vector<1x8x1xf32> -> vector<1x8x1xf32>
    %82 = vector.broadcast %81 : vector<1x8x1xf32> to vector<1x8x8xf32>
    %83 = arith.mulf %78, %82 : vector<1x8x8xf32>
    %84 = arith.truncf %83 : vector<1x8x8xf32> to vector<1x8x8xbf16>
    "tpu.trace_start"() <{level = 10 : i32, message = "bqk,bkd->bqd"}> : () -> ()
    %cst_33 = arith.constant dense<0.000000e+00> : vector<1x8x8xf32>
    %85 = tpu.matmul %84, %72, %cst_33 {dimension_numbers = #tpu.dot_dimension_numbers<[2], [1], [1], [2], [0, 0, 0, 1, 1, 2], [0], [0]>} : vector<1x8x8xbf16>, vector<1x8x8xbf16>, vector<1x8x8xf32> -> vector<1x8x8xf32>
    "tpu.trace_stop"() : () -> ()
    %86 = vector.shape_cast %85 : vector<1x8x8xf32> to vector<8x8xf32>
    %c0_34 = arith.constant 0 : index
    %c8 = arith.constant 8 : index
    %87 = vector.load %arg20[%c0_34, %c8] : memref<8x32xf32, #tpu.memory_space<vmem>>, vector<8x8xf32>
    tpu.vector_store %arg20[%c0_34, %c8], %86 {strides = array<i32>} : memref<8x32xf32, #tpu.memory_space<vmem>>, vector<8x8xf32>,
    %88 = vector.extract_strided_slice %33 {offsets = [0, 16], sizes = [8, 8], strides = [1, 1]} : vector<8x32xf32> to vector<8x8xf32>
    %89 = vector.shape_cast %88 : vector<8x8xf32> to vector<1x8x8xf32>
    %90 = arith.truncf %89 : vector<1x8x8xf32> to vector<1x8x8xbf16>
    %91 = vector.extract_strided_slice %36 {offsets = [0, 16], sizes = [8, 8], strides = [1, 1]} : vector<8x32xf32> to vector<8x8xf32>
    %92 = vector.shape_cast %91 : vector<8x8xf32> to vector<1x8x8xf32>
    %93 = arith.truncf %92 : vector<1x8x8xf32> to vector<1x8x8xbf16>
    %94 = vector.extract_strided_slice %39 {offsets = [0, 16], sizes = [8, 8], strides = [1, 1]} : vector<8x32xf32> to vector<8x8xf32>
    %95 = vector.shape_cast %94 : vector<8x8xf32> to vector<1x8x8xf32>
    %96 = arith.truncf %95 : vector<1x8x8xf32> to vector<1x8x8xbf16>
    "tpu.trace_start"() <{level = 10 : i32, message = "bqd,bkd->bqk"}> : () -> ()
    %cst_35 = arith.constant dense<0.000000e+00> : vector<1x8x8xf32>
    %97 = tpu.matmul %90, %93, %cst_35 {dimension_numbers = #tpu.dot_dimension_numbers<[2], [2], [1], [1], [0, 0, 0, 1, 1, 1], [0], [0]>} : vector<1x8x8xbf16>, vector<1x8x8xbf16>, vector<1x8x8xf32> -> vector<1x8x8xf32>
    "tpu.trace_stop"() : () -> ()
    %cst_36 = arith.constant dense<0xFF800000> : vector<1x8xf32>
    %98 = vector.multi_reduction <maximumf>, %97, %cst_36 [2] : vector<1x8x8xf32> to vector<1x8xf32>
    %99 = vector.shape_cast %98 : vector<1x8xf32> to vector<1x8x1xf32>
    %100 = vector.broadcast %99 : vector<1x8x1xf32> to vector<1x8x8xf32>
    %101 = arith.subf %97, %100 : vector<1x8x8xf32>
    %102 = math.exp %101 : vector<1x8x8xf32>
    %cst_37 = arith.constant dense<0.000000e+00> : vector<1x8xf32>
    %103 = vector.multi_reduction <add>, %102, %cst_37 [2] : vector<1x8x8xf32> to vector<1x8xf32>
    %104 = vector.shape_cast %103 : vector<1x8xf32> to vector<1x8x1xf32>
    %105 = tpu.reciprocal %104 {approx = true} : vector<1x8x1xf32> -> vector<1x8x1xf32>
    %106 = vector.broadcast %105 : vector<1x8x1xf32> to vector<1x8x8xf32>
    %107 = arith.mulf %102, %106 : vector<1x8x8xf32>
    %108 = arith.truncf %107 : vector<1x8x8xf32> to vector<1x8x8xbf16>
    "tpu.trace_start"() <{level = 10 : i32, message = "bqk,bkd->bqd"}> : () -> ()
    %cst_38 = arith.constant dense<0.000000e+00> : vector<1x8x8xf32>
    %109 = tpu.matmul %108, %96, %cst_38 {dimension_numbers = #tpu.dot_dimension_numbers<[2], [1], [1], [2], [0, 0, 0, 1, 1, 2], [0], [0]>} : vector<1x8x8xbf16>, vector<1x8x8xbf16>, vector<1x8x8xf32> -> vector<1x8x8xf32>
    "tpu.trace_stop"() : () -> ()
    %110 = vector.shape_cast %109 : vector<1x8x8xf32> to vector<8x8xf32>
    %c0_39 = arith.constant 0 : index
    %c16 = arith.constant 16 : index
    %111 = vector.load %arg20[%c0_39, %c16] : memref<8x32xf32, #tpu.memory_space<vmem>>, vector<8x8xf32>
    tpu.vector_store %arg20[%c0_39, %c16], %110 {strides = array<i32>} : memref<8x32xf32, #tpu.memory_space<vmem>>, vector<8x8xf32>,
    %112 = vector.extract_strided_slice %33 {offsets = [0, 24], sizes = [8, 8], strides = [1, 1]} : vector<8x32xf32> to vector<8x8xf32>
    %113 = vector.shape_cast %112 : vector<8x8xf32> to vector<1x8x8xf32>
    %114 = arith.truncf %113 : vector<1x8x8xf32> to vector<1x8x8xbf16>
    %115 = vector.extract_strided_slice %36 {offsets = [0, 24], sizes = [8, 8], strides = [1, 1]} : vector<8x32xf32> to vector<8x8xf32>
    %116 = vector.shape_cast %115 : vector<8x8xf32> to vector<1x8x8xf32>
    %117 = arith.truncf %116 : vector<1x8x8xf32> to vector<1x8x8xbf16>
    %118 = vector.extract_strided_slice %39 {offsets = [0, 24], sizes = [8, 8], strides = [1, 1]} : vector<8x32xf32> to vector<8x8xf32>
    %119 = vector.shape_cast %118 : vector<8x8xf32> to vector<1x8x8xf32>
    %120 = arith.truncf %119 : vector<1x8x8xf32> to vector<1x8x8xbf16>
    "tpu.trace_start"() <{level = 10 : i32, message = "bqd,bkd->bqk"}> : () -> ()
    %cst_40 = arith.constant dense<0.000000e+00> : vector<1x8x8xf32>
    %121 = tpu.matmul %114, %117, %cst_40 {dimension_numbers = #tpu.dot_dimension_numbers<[2], [2], [1], [1], [0, 0, 0, 1, 1, 1], [0], [0]>} : vector<1x8x8xbf16>, vector<1x8x8xbf16>, vector<1x8x8xf32> -> vector<1x8x8xf32>
    "tpu.trace_stop"() : () -> ()
    %cst_41 = arith.constant dense<0xFF800000> : vector<1x8xf32>
    %122 = vector.multi_reduction <maximumf>, %121, %cst_41 [2] : vector<1x8x8xf32> to vector<1x8xf32>
    %123 = vector.shape_cast %122 : vector<1x8xf32> to vector<1x8x1xf32>
    %124 = vector.broadcast %123 : vector<1x8x1xf32> to vector<1x8x8xf32>
    %125 = arith.subf %121, %124 : vector<1x8x8xf32>
    %126 = math.exp %125 : vector<1x8x8xf32>
    %cst_42 = arith.constant dense<0.000000e+00> : vector<1x8xf32>
    %127 = vector.multi_reduction <add>, %126, %cst_42 [2] : vector<1x8x8xf32> to vector<1x8xf32>
    %128 = vector.shape_cast %127 : vector<1x8xf32> to vector<1x8x1xf32>
    %129 = tpu.reciprocal %128 {approx = true} : vector<1x8x1xf32> -> vector<1x8x1xf32>
    %130 = vector.broadcast %129 : vector<1x8x1xf32> to vector<1x8x8xf32>
    %131 = arith.mulf %126, %130 : vector<1x8x8xf32>
    %132 = arith.truncf %131 : vector<1x8x8xf32> to vector<1x8x8xbf16>
    "tpu.trace_start"() <{level = 10 : i32, message = "bqk,bkd->bqd"}> : () -> ()
    %cst_43 = arith.constant dense<0.000000e+00> : vector<1x8x8xf32>
    %133 = tpu.matmul %132, %120, %cst_43 {dimension_numbers = #tpu.dot_dimension_numbers<[2], [1], [1], [2], [0, 0, 0, 1, 1, 2], [0], [0]>} : vector<1x8x8xbf16>, vector<1x8x8xbf16>, vector<1x8x8xf32> -> vector<1x8x8xf32>
    "tpu.trace_stop"() : () -> ()
    %134 = vector.shape_cast %133 : vector<1x8x8xf32> to vector<8x8xf32>
    %c0_44 = arith.constant 0 : index
    %c24 = arith.constant 24 : index
    %135 = vector.load %arg20[%c0_44, %c24] : memref<8x32xf32, #tpu.memory_space<vmem>>, vector<8x8xf32>
    tpu.vector_store %arg20[%c0_44, %c24], %134 {strides = array<i32>} : memref<8x32xf32, #tpu.memory_space<vmem>>, vector<8x8xf32>,
    %c0_45 = arith.constant 0 : index
    %c0_46 = arith.constant 0 : index
    %c0_47 = arith.constant 0 : index
    %136 = vector.load %arg9[%c0_45, %c0_46, %c0_47] : memref<1x1x32xf32, #tpu.memory_space<vmem>>, vector<1x1x32xf32>
    %137 = vector.shape_cast %136 : vector<1x1x32xf32> to vector<1x32xf32>
    %138 = vector.broadcast %137 : vector<1x32xf32> to vector<8x32xf32>
    %139 = arith.addf %3, %138 : vector<8x32xf32>
    %c0_48 = arith.constant 0 : index
    %c0_49 = arith.constant 0 : index
    %140 = vector.load %arg20[%c0_48, %c0_49] : memref<8x32xf32, #tpu.memory_space<vmem>>, vector<8x32xf32>
    %141 = arith.truncf %140 : vector<8x32xf32> to vector<8x32xbf16>
    %c0_50 = arith.constant 0 : index
    %c0_51 = arith.constant 0 : index
    %c0_52 = arith.constant 0 : index
    %142 = vector.load %arg8[%c0_50, %c0_51, %c0_52] : memref<1x32x32xbf16, #tpu.memory_space<vmem>>, vector<1x32x32xbf16>
    %143 = vector.shape_cast %142 : vector<1x32x32xbf16> to vector<32x32xbf16>
    %cst_53 = arith.constant dense<0.000000e+00> : vector<8x32xf32>
    %144 = tpu.matmul %141, %143, %cst_53 {dimension_numbers = #tpu.dot_dimension_numbers<[1], [0], [0], [1], [0, 0, 1, 1], [], []>} : vector<8x32xbf16>, vector<32x32xbf16>, vector<8x32xf32> -> vector<8x32xf32>
    %145 = arith.addf %139, %144 : vector<8x32xf32>
    %c0_54 = arith.constant 0 : index
    %c0_55 = arith.constant 0 : index
    %c0_56 = arith.constant 0 : index
    %146 = vector.load %arg10[%c0_54, %c0_55, %c0_56] : memref<1x1x32xf32, #tpu.memory_space<vmem>>, vector<1x1x32xf32>
    %147 = vector.shape_cast %146 : vector<1x1x32xf32> to vector<1x32xf32>
    %c0_57 = arith.constant 0 : index
    %c0_58 = arith.constant 0 : index
    %c0_59 = arith.constant 0 : index
    %148 = vector.load %arg11[%c0_57, %c0_58, %c0_59] : memref<1x1x32xf32, #tpu.memory_space<vmem>>, vector<1x1x32xf32>
    %149 = vector.shape_cast %148 : vector<1x1x32xf32> to vector<1x32xf32>
    %cst_60 = arith.constant dense<0.000000e+00> : vector<8xf32>
    %150 = vector.multi_reduction <add>, %145, %cst_60 [1] : vector<8x32xf32> to vector<8xf32>
    %151 = vector.shape_cast %150 : vector<8xf32> to vector<8x1xf32>
    %cst_61 = arith.constant 3.200000e+01 : f32
    %152 = vector.broadcast %cst_61 : f32 to vector<8x1xf32>
    %153 = arith.divf %151, %152 : vector<8x1xf32>
    %154 = vector.broadcast %153 : vector<8x1xf32> to vector<8x32xf32>
    %155 = arith.subf %145, %154 : vector<8x32xf32>
    %156 = arith.mulf %155, %155 : vector<8x32xf32>
    %cst_62 = arith.constant dense<0.000000e+00> : vector<8xf32>
    %157 = vector.multi_reduction <add>, %156, %cst_62 [1] : vector<8x32xf32> to vector<8xf32>
    %158 = vector.shape_cast %157 : vector<8xf32> to vector<8x1xf32>
    %cst_63 = arith.constant 3.200000e+01 : f32
    %159 = vector.broadcast %cst_63 : f32 to vector<8x1xf32>
    %160 = arith.divf %158, %159 : vector<8x1xf32>
    %161 = vector.broadcast %153 : vector<8x1xf32> to vector<8x32xf32>
    %162 = arith.subf %145, %161 : vector<8x32xf32>
    %cst_64 = arith.constant 9.99999974E-6 : f32
    %163 = vector.broadcast %cst_64 : f32 to vector<8x1xf32>
    %164 = arith.addf %160, %163 : vector<8x1xf32>
    %165 = math.rsqrt %164 : vector<8x1xf32>
    %166 = vector.broadcast %165 : vector<8x1xf32> to vector<8x32xf32>
    %167 = arith.mulf %162, %166 : vector<8x32xf32>
    %168 = vector.broadcast %147 : vector<1x32xf32> to vector<8x32xf32>
    %169 = arith.mulf %167, %168 : vector<8x32xf32>
    %170 = vector.broadcast %149 : vector<1x32xf32> to vector<8x32xf32>
    %171 = arith.addf %169, %170 : vector<8x32xf32>
    %172 = arith.truncf %171 : vector<8x32xf32> to vector<8x32xbf16>
    %c0_65 = arith.constant 0 : index
    %c0_66 = arith.constant 0 : index
    %c0_67 = arith.constant 0 : index
    %173 = vector.load %arg12[%c0_65, %c0_66, %c0_67] : memref<1x32x128xbf16, #tpu.memory_space<vmem>>, vector<1x32x128xbf16>
    %174 = vector.shape_cast %173 : vector<1x32x128xbf16> to vector<32x128xbf16>
    %cst_68 = arith.constant dense<0.000000e+00> : vector<8x128xf32>
    %175 = tpu.matmul %172, %174, %cst_68 {dimension_numbers = #tpu.dot_dimension_numbers<[1], [0], [0], [1], [0, 0, 1, 1], [], []>} : vector<8x32xbf16>, vector<32x128xbf16>, vector<8x128xf32> -> vector<8x128xf32>
    %c0_69 = arith.constant 0 : index
    %c0_70 = arith.constant 0 : index
    %c0_71 = arith.constant 0 : index
    %176 = vector.load %arg13[%c0_69, %c0_70, %c0_71] : memref<1x1x128xf32, #tpu.memory_space<vmem>>, vector<1x1x128xf32>
    %177 = vector.shape_cast %176 : vector<1x1x128xf32> to vector<1x128xf32>
    %178 = vector.broadcast %177 : vector<1x128xf32> to vector<8x128xf32>
    %179 = arith.addf %175, %178 : vector<8x128xf32>
    %cst_72 = arith.constant 5.000000e-01 : f32
    %180 = vector.broadcast %cst_72 : f32 to vector<8x128xf32>
    %181 = arith.mulf %180, %179 : vector<8x128xf32>
    %cst_73 = arith.constant 0.707106769 : f32
    %182 = vector.broadcast %cst_73 : f32 to vector<8x128xf32>
    %183 = arith.mulf %179, %182 : vector<8x128xf32>
    %184 = math.erf %183 : vector<8x128xf32>
    %cst_74 = arith.constant 1.000000e+00 : f32
    %185 = vector.broadcast %cst_74 : f32 to vector<8x128xf32>
    %186 = arith.addf %185, %184 : vector<8x128xf32>
    %187 = arith.mulf %181, %186 : vector<8x128xf32>
    %188 = arith.truncf %187 : vector<8x128xf32> to vector<8x128xbf16>
    %c0_75 = arith.constant 0 : index
    %c0_76 = arith.constant 0 : index
    %c0_77 = arith.constant 0 : index
    %189 = vector.load %arg14[%c0_75, %c0_76, %c0_77] : memref<1x128x32xbf16, #tpu.memory_space<vmem>>, vector<1x128x32xbf16>
    %190 = vector.shape_cast %189 : vector<1x128x32xbf16> to vector<128x32xbf16>
    %cst_78 = arith.constant dense<0.000000e+00> : vector<8x32xf32>
    %191 = tpu.matmul %188, %190, %cst_78 {dimension_numbers = #tpu.dot_dimension_numbers<[1], [0], [0], [1], [0, 0, 1, 1], [], []>} : vector<8x128xbf16>, vector<128x32xbf16>, vector<8x32xf32> -> vector<8x32xf32>
    %c0_79 = arith.constant 0 : index
    %c0_80 = arith.constant 0 : index
    %c0_81 = arith.constant 0 : index
    %192 = vector.load %arg15[%c0_79, %c0_80, %c0_81] : memref<1x1x32xf32, #tpu.memory_space<vmem>>, vector<1x1x32xf32>
    %193 = vector.shape_cast %192 : vector<1x1x32xf32> to vector<1x32xf32>
    %194 = vector.broadcast %193 : vector<1x32xf32> to vector<8x32xf32>
    %195 = arith.addf %191, %194 : vector<8x32xf32>
    %196 = arith.addf %195, %145 : vector<8x32xf32>
    %c0_82 = arith.constant 0 : index
    %c0_83 = arith.constant 0 : index
    %197 = vector.load %arg19[%c0_82, %c0_83] : memref<8x32xf32, #tpu.memory_space<vmem>>, vector<8x32xf32>
    tpu.vector_store %arg19[%c0_82, %c0_83], %196 {strides = array<i32>} : memref<8x32xf32, #tpu.memory_space<vmem>>, vector<8x32xf32>,
    %c1_i32 = arith.constant 1 : i32
    %198 = arith.cmpi eq, %arg1, %c1_i32 : i32
    %199 = arith.extui %198 : i1 to i32
    %c0_i32_84 = arith.constant 0 : i32
    %200 = arith.cmpi ne, %199, %c0_i32_84 : i32
    scf.if %200 {
      %c0_85 = arith.constant 0 : index
      %c0_86 = arith.constant 0 : index
      %201 = vector.load %arg16[%c0_85, %c0_86] : memref<1x32xf32, #tpu.memory_space<vmem>>, vector<1x32xf32>
      %c0_87 = arith.constant 0 : index
      %c0_88 = arith.constant 0 : index
      %202 = vector.load %arg17[%c0_87, %c0_88] : memref<1x32xf32, #tpu.memory_space<vmem>>, vector<1x32xf32>
      %cst_89 = arith.constant dense<0.000000e+00> : vector<8xf32>
      %203 = vector.multi_reduction <add>, %196, %cst_89 [1] : vector<8x32xf32> to vector<8xf32>
      %204 = vector.shape_cast %203 : vector<8xf32> to vector<8x1xf32>
      %cst_90 = arith.constant 3.200000e+01 : f32
      %205 = vector.broadcast %cst_90 : f32 to vector<8x1xf32>
      %206 = arith.divf %204, %205 : vector<8x1xf32>
      %207 = vector.broadcast %206 : vector<8x1xf32> to vector<8x32xf32>
      %208 = arith.subf %196, %207 : vector<8x32xf32>
      %209 = arith.mulf %208, %208 : vector<8x32xf32>
      %cst_91 = arith.constant dense<0.000000e+00> : vector<8xf32>
      %210 = vector.multi_reduction <add>, %209, %cst_91 [1] : vector<8x32xf32> to vector<8xf32>
      %211 = vector.shape_cast %210 : vector<8xf32> to vector<8x1xf32>
      %cst_92 = arith.constant 3.200000e+01 : f32
      %212 = vector.broadcast %cst_92 : f32 to vector<8x1xf32>
      %213 = arith.divf %211, %212 : vector<8x1xf32>
      %214 = vector.broadcast %206 : vector<8x1xf32> to vector<8x32xf32>
      %215 = arith.subf %196, %214 : vector<8x32xf32>
      %cst_93 = arith.constant 9.99999974E-6 : f32
      %216 = vector.broadcast %cst_93 : f32 to vector<8x1xf32>
      %217 = arith.addf %213, %216 : vector<8x1xf32>
      %218 = math.rsqrt %217 : vector<8x1xf32>
      %219 = vector.broadcast %218 : vector<8x1xf32> to vector<8x32xf32>
      %220 = arith.mulf %215, %219 : vector<8x32xf32>
      %221 = vector.broadcast %201 : vector<1x32xf32> to vector<8x32xf32>
      %222 = arith.mulf %220, %221 : vector<8x32xf32>
      %223 = vector.broadcast %202 : vector<1x32xf32> to vector<8x32xf32>
      %224 = arith.addf %222, %223 : vector<8x32xf32>
      %225 = vector.shape_cast %224 : vector<8x32xf32> to vector<1x8x32xf32>
      %c0_94 = arith.constant 0 : index
      %c0_95 = arith.constant 0 : index
      %c0_96 = arith.constant 0 : index
      %226 = vector.load %arg18[%c0_94, %c0_95, %c0_96] : memref<1x8x32xf32, #tpu.memory_space<vmem>>, vector<1x8x32xf32>
      tpu.vector_store %arg18[%c0_94, %c0_95, %c0_96], %225 {strides = array<i32>} : memref<1x8x32xf32, #tpu.memory_space<vmem>>, vector<1x8x32xf32>,
    } else {
    }
    return
  }
  func.func @transform_0(%arg0: i32, %arg1: i32) -> (i32, i32, i32) {
    %c0_i32 = arith.constant 0 : i32
    %c0_i32_0 = arith.constant 0 : i32
    %c0_i32_1 = arith.constant 0 : i32
    return %arg0, %c0_i32, %c0_i32_0 : i32, i32, i32
  }
  func.func @transform_1(%arg0: i32, %arg1: i32) -> (i32, i32, i32) {
    %c0_i32 = arith.constant 0 : i32
    %c0_i32_0 = arith.constant 0 : i32
    %c0_i32_1 = arith.constant 0 : i32
    return %arg1, %c0_i32, %c0_i32_0 : i32, i32, i32
  }
  func.func @transform_2(%arg0: i32, %arg1: i32) -> (i32, i32, i32) {
    %c0_i32 = arith.constant 0 : i32
    %c0_i32_0 = arith.constant 0 : i32
    %c0_i32_1 = arith.constant 0 : i32
    return %arg1, %c0_i32, %c0_i32_0 : i32, i32, i32
  }
  func.func @transform_3(%arg0: i32, %arg1: i32) -> (i32, i32, i32) {
    %c0_i32 = arith.constant 0 : i32
    %c0_i32_0 = arith.constant 0 : i32
    %c0_i32_1 = arith.constant 0 : i32
    return %arg1, %c0_i32, %c0_i32_0 : i32, i32, i32
  }
  func.func @transform_4(%arg0: i32, %arg1: i32) -> (i32, i32, i32) {
    %c0_i32 = arith.constant 0 : i32
    %c0_i32_0 = arith.constant 0 : i32
    %c0_i32_1 = arith.constant 0 : i32
    return %arg1, %c0_i32, %c0_i32_0 : i32, i32, i32
  }
  func.func @transform_5(%arg0: i32, %arg1: i32) -> (i32, i32, i32) {
    %c0_i32 = arith.constant 0 : i32
    %c0_i32_0 = arith.constant 0 : i32
    %c0_i32_1 = arith.constant 0 : i32
    return %arg1, %c0_i32, %c0_i32_0 : i32, i32, i32
  }
  func.func @transform_6(%arg0: i32, %arg1: i32) -> (i32, i32, i32) {
    %c0_i32 = arith.constant 0 : i32
    %c0_i32_0 = arith.constant 0 : i32
    %c0_i32_1 = arith.constant 0 : i32
    return %arg1, %c0_i32, %c0_i32_0 : i32, i32, i32
  }
  func.func @transform_7(%arg0: i32, %arg1: i32) -> (i32, i32, i32) {
    %c0_i32 = arith.constant 0 : i32
    %c0_i32_0 = arith.constant 0 : i32
    %c0_i32_1 = arith.constant 0 : i32
    return %arg1, %c0_i32, %c0_i32_0 : i32, i32, i32
  }
  func.func @transform_8(%arg0: i32, %arg1: i32) -> (i32, i32, i32) {
    %c0_i32 = arith.constant 0 : i32
    %c0_i32_0 = arith.constant 0 : i32
    %c0_i32_1 = arith.constant 0 : i32
    return %arg1, %c0_i32, %c0_i32_0 : i32, i32, i32
  }
  func.func @transform_9(%arg0: i32, %arg1: i32) -> (i32, i32, i32) {
    %c0_i32 = arith.constant 0 : i32
    %c0_i32_0 = arith.constant 0 : i32
    %c0_i32_1 = arith.constant 0 : i32
    return %arg1, %c0_i32, %c0_i32_0 : i32, i32, i32
  }
  func.func @transform_10(%arg0: i32, %arg1: i32) -> (i32, i32, i32) {
    %c0_i32 = arith.constant 0 : i32
    %c0_i32_0 = arith.constant 0 : i32
    %c0_i32_1 = arith.constant 0 : i32
    return %arg1, %c0_i32, %c0_i32_0 : i32, i32, i32
  }
  func.func @transform_11(%arg0: i32, %arg1: i32) -> (i32, i32, i32) {
    %c0_i32 = arith.constant 0 : i32
    %c0_i32_0 = arith.constant 0 : i32
    %c0_i32_1 = arith.constant 0 : i32
    return %arg1, %c0_i32, %c0_i32_0 : i32, i32, i32
  }
  func.func @transform_12(%arg0: i32, %arg1: i32) -> (i32, i32, i32) {
    %c0_i32 = arith.constant 0 : i32
    %c0_i32_0 = arith.constant 0 : i32
    %c0_i32_1 = arith.constant 0 : i32
    return %arg1, %c0_i32, %c0_i32_0 : i32, i32, i32
  }
  func.func @transform_13(%arg0: i32, %arg1: i32) -> (i32, i32, i32) {
    %c0_i32 = arith.constant 0 : i32
    %c0_i32_0 = arith.constant 0 : i32
    %c0_i32_1 = arith.constant 0 : i32
    return %arg1, %c0_i32, %c0_i32_0 : i32, i32, i32
  }
  func.func @transform_14(%arg0: i32, %arg1: i32) -> (i32, i32) {
    %c0_i32 = arith.constant 0 : i32
    %c0_i32_0 = arith.constant 0 : i32
    %c0_i32_1 = arith.constant 0 : i32
    return %c0_i32, %c0_i32_0 : i32, i32
  }
  func.func @transform_15(%arg0: i32, %arg1: i32) -> (i32, i32) {
    %c0_i32 = arith.constant 0 : i32
    %c0_i32_0 = arith.constant 0 : i32
    %c0_i32_1 = arith.constant 0 : i32
    return %c0_i32, %c0_i32_0 : i32, i32
  }
  func.func @transform_16(%arg0: i32, %arg1: i32) -> (i32, i32, i32) {
    %c0_i32 = arith.constant 0 : i32
    %c0_i32_0 = arith.constant 0 : i32
    %c0_i32_1 = arith.constant 0 : i32
    return %arg0, %c0_i32, %c0_i32_0 : i32, i32, i32
  }
}

</mosaic_0001>

<bundles_post_ra>
// kernel: tpu_custom_call.1
= control target key start
LH: loop header
LB: loop body
LE: loop exit
PB: predicated region body
PF: predicated region fallthrough
CT: control target
= control target key end

     0   :  { %s2744_s0 = inlined_call_operand.hbm [shape: f32[2,8,32], index: 0, kind: input, shape index: {}]   ;;  %s2745_s1 = inlined_call_operand.hbm [shape: f32[2,1,32], index: 1, kind: input, shape index: {}]   ;;  %s2746_s2 = inlined_call_operand.hbm [shape: f32[2,1,32], index: 2, kind: input, shape index: {}]   ;;  %s2747_s3 = inlined_call_operand.vmem [shape: bf16[2,32,32], index: 3, kind: input, shape index: {}]   ;;  %s2748_s4 = inlined_call_operand.vmem [shape: bf16[2,32,32], index: 4, kind: input, shape index: {}]   ;;  %s2749_s5 = inlined_call_operand.vmem [shape: bf16[2,32,32], index: 5, kind: input, shape index: {}]   ;;  %s2750_s6 = inlined_call_operand.vmem [shape: bf16[2,32,32], index: 6, kind: input, shape index: {}]   ;;  %s2751_s7 = inlined_call_operand.vmem [shape: f32[2,1,32], index: 7, kind: input, shape index: {}]   ;;  %s2752_s8 = inlined_call_operand.vmem [shape: f32[2,1,32], index: 8, kind: input, shape index: {}]   ;;  %s2753_s9 = inlined_call_operand.vmem [shape: f32[2,1,32], index: 9, kind: input, shape index: {}]   ;;  %s2754_s10 = inlined_call_operand.vmem [shape: bf16[2,32,128], index: 10, kind: input, shape index: {}]   ;;  %s2755_s11 = inlined_call_operand.vmem [shape: f32[2,1,128], index: 11, kind: input, shape index: {}]   ;;  %s2756_s12 = inlined_call_operand.vmem [shape: bf16[2,128,32], index: 12, kind: input, shape index: {}]   ;;  %s2757_s13 = inlined_call_operand.vmem [shape: f32[2,1,32], index: 13, kind: input, shape index: {}]   ;;  %s2758_s14 = inlined_call_operand.vmem [shape: f32[1,32], index: 14, kind: input, shape index: {}]   ;;  %s2759_s15 = inlined_call_operand.vmem [shape: f32[1,32], index: 15, kind: input, shape index: {}]   ;;  %s2760_s16 = inlined_call_operand.hbm [shape: f32[2,8,32], index: 16, kind: output, shape index: {}]  }
   0x1   :  { %2780 = sst [smem:[#allocation31_spill]] %s2744_s0 }
   0x2   :  { %2781 = sst [smem:[#allocation32_spill]] %s2745_s1 }
   0x3   :  { %2782 = sst [smem:[#allocation33_spill]] %s2746_s2 }
   0x4   :  { %2783 = sst [smem:[#allocation34_spill]] %s2747_s3 }
   0x5   :  { %2784 = sst [smem:[#allocation35_spill]] %s2748_s4 }
   0x6   :  { %2785 = sst [smem:[#allocation36_spill]] %s2749_s5 }
   0x7   :  { %2786 = sst [smem:[#allocation37_spill]] %s2750_s6 }
   0x8   :  { %2787 = sst [smem:[#allocation38_spill]] %s2751_s7 }
   0x9   :  { %2788 = sst [smem:[#allocation39_spill]] %s2752_s8 }
   0xa   :  { %2789 = sst [smem:[#allocation40_spill]] %s2753_s9 }
   0xb   :  { %2790 = sst [smem:[#allocation41_spill]] %s2754_s10 }
   0xc   :  { %2791 = sst [smem:[#allocation42_spill]] %s2755_s11 }
   0xd   :  { %2792 = sst [smem:[#allocation43_spill]] %s2756_s12 }
   0xe   :  { %2793 = sst [smem:[#allocation44_spill]] %s2757_s13 }
   0xf   :  { %2794 = sst [smem:[#allocation45_spill]] %s2758_s14 }
  0x10   :  { %2795 = sst [smem:[#allocation46_spill]] %s2759_s15 }
  0x11   :  { %2796 = sst [smem:[#allocation47_spill]] %s2760_s16 }
  0x12   :  { %21 = vsyncpa [#allocation5], 0 }
  0x13   :  { %23 = vsyncpa [#allocation5 + $0x1], 0 }
  0x14   :  { %24 = vsyncpa [#allocation8], 0 }
  0x15   :  { %26 = vsyncpa [#allocation8 + $0x1], 0 }
  0x16   :  { %27 = vsyncpa [#allocation6], 0 }
  0x17   :  { %29 = vsyncpa [#allocation6 + $0x1], 0  ;;  %s2323_s21 = smov 0   ;;  %s2325_s22 = smov 0  }
  0x18   :  { %s2327_s23 = smov 0   ;;  %s2329_s24 = smov 0  }
  0x19   :  { %s2331_s25 = smov 0   ;;  %s2333_s26 = smov 0  }
  0x1a   :  { %s2335_s27 = smov 0   ;;  %s2337_s28 = smov 0  }
  0x1b   :  { %s2339_s29 = smov 0   ;;  %s2341_s30 = smov 0  }
  0x1c   :  { %s2343_s0 = smov 0  }
  0x1d LB: > { %2797 = sst [smem:[#allocation14_spill]] %s2193_s22  ;;  %s2377_s17 = sadd.s32 4294967295, %s2229_s0   ;;  %s2229_s0 = sphi %s2343_s0, %s35_s0   ;;  %s2225_s30 = sphi %s2341_s30, %s2865_s30   ;;  %s2221_s29 = sphi %s2339_s29, %s2864_s29   ;;  %s2217_s28 = sphi %s2337_s28, %s2863_s28   ;;  %s2213_s27 = sphi %s2335_s27, %s2862_s27   ;;  %s2209_s26 = sphi %s2333_s26, %s2861_s26   ;;  %s2205_s25 = sphi %s2331_s25, %s2860_s25   ;;  %s2201_s24 = sphi %s2329_s24, %s2859_s24   ;;  %s2197_s23 = sphi %s2327_s23, %s2858_s23   ;;  %s2193_s22 = sphi %s2325_s22, %s2857_s22   ;;  %s2189_s21 = sphi %s2323_s21, %s2856_s21  }
  0x1e   : > { %2798 = sst [smem:[#allocation15_spill]] %s2197_s23  ;;  %s44_s18 = sadd.s32 1, %s2221_s29 }
  0x1f   : > { %2799 = sst [smem:[#allocation16_spill]] %s2201_s24  ;;  %p2380_p0 = scmp.ge.s32.totalorder %s44_s18, 2 }
  0x20   : > { %2800 = sst [smem:[#allocation17_spill]] %s2205_s25  ;;  %p62_p1 = scmp.eq.s32.totalorder %s2229_s0, 0 }
  0x21   : > { %2801 = sst [smem:[#allocation18_spill]] %s2209_s26  ;;  %p68_p2 = scmp.eq.s32.totalorder %s2377_s17, 0 }
  0x22   : > { %2802 = sst [smem:[#allocation19_spill]] %s2217_s28  ;;  %s80_s20 = sadd.s32 1, %s2197_s23 }
  0x23   : > { %2803 = sst [smem:[#allocation20_spill]] %s2221_s29  ;;  %s2867_s18 = smov (%p2380_p0, %s44_s18), 0 }
  0x24   : > { %2804 = sst [smem:[#allocation21_spill]] %s2225_s30  ;;  %p87_p3 = scmp.ne.s32.totalorder %s2197_s23, %s2193_s22 }
  0x25   : > { %2805 = sst [smem:[#allocation22_spill]] %s2229_s0  ;;  %p93_p4 = scmp.ne.s32.totalorder %s2193_s22, %s2189_s21 }
  0x26   : > { %2807 = sst [smem:[#allocation23_spill]] %s2867_s18  ;;  %s77_s16 = ssub.s32 %s2221_s29, %s2867_s18 }
  0x27   : > { %p78_p5 = scmp.eq.s32.totalorder %s77_s16, 0  ;;  %p89_p6 = por %p87_p3, %p62_p1 }
  0x28   : > { %p2400_p7 = por %p93_p4, %p68_p2  ;;  %p2764_p8 = scmp.lt.s32.totalorder %s2229_s0, 4 }
  0x29   : > { %s2406_s15 = scalar_select %p78_p5, %s2197_s23, %s80_s20  }
  0x2a   : > { %s522_s14 = sand.u32 1, %s2229_s0   ;;  %s2763_s12 = sand.u32 1, %s2197_s23  }
  0x2b   : > { %2809 = sst [smem:[#allocation24_spill]] %s2406_s15  ;;  %s525_s18 = scalar_lea.vmem [#allocation7], %s2763_s12 }
  0x2c   : > { %s2810_s1 = sld [smem:[#allocation32_spill]]  ;;  %s532_s11 = sshll.u32 %s525_s18, 4  ;;  %s533_s11 = int_to_ptr.vmem [resolvable:$true] %s532_s11 }
  0x2d   : > { %p2418_p9 = pnand %p2764_p8, %p89_p6  ;;  %p1728_p10 = scmp.ge.s32.totalorder %s2229_s0, 1 }
  0x2e   : > { %p632_p11 = scmp.lt.s32.totalorder %s2229_s0, 5  ;;  %s2424_s13 = scalar_lea.sflag [#allocation8], %s522_s14 }
  0x2f   : > { %s1723_s21 = sadd.s32 4294967294, %s2229_s0   ;;  %s54_s12 = sadd.s32 1, %s2209_s26 }
  0x30   : > { %p2429_p12 = pnand %p1728_p10, %p632_p11  ;;  %p61_p13 = scmp.ne.s32.totalorder %s2209_s26, %s2205_s25 }
  0x31   : > { %p67_p3 = scmp.ne.s32.totalorder %s2205_s25, %s2201_s24  ;;  %p471_p5 = scmp.eq.s32.totalorder %s2377_s17, 3 }
  0x32   : > { %s528_s16 = scalar_lea.hbm %s2810_s1, %s2221_s29  ;;  %p2446_p6 = por %p62_p1, %p61_p13 }
  0x33   : > { %s530_s10 = sshll.u32 %s528_s16, 4  ;;  %s47_s16 = sadd.s32 1, %s2225_s30  ;;  %s531_s10 = int_to_ptr.hbm [resolvable:$true] %s530_s10 }
  0x34   : > { %1873 = dma.hbm_to_vmem [thread:$0]  (!%p2418_p9), %s531_s10, 16, %s533_s11, %s2424_s13  }
  0x35   : > { %s2869_s16 = smov (!%p2380_p0, %s47_s16), %s2225_s30  ;;  %p2452_p10 = por %p68_p2, %p67_p3 }
  0x36   : > { %p49_p4 = scmp.ge.s32.totalorder %s2869_s16, 2  ;;  %p2458_p0 = por %p471_p5, %p61_p13 }
  0x37   : > { %p477_p11 = scmp.eq.s32.totalorder %s1723_s21, 3  ;;  %s503_s1 = sand.u32 1, %s2209_s26  }
  0x38   : > { %s2871_s16 = smov (%p49_p4, %s2869_s16), 0  ;;  %s1726_s24 = sshll.u32 %s503_s1, 3 }
  0x39   : > { %2815 = sst [smem:[#allocation25_spill]] %s2871_s16  ;;  %s51_s19 = ssub.s32 %s2225_s30, %s2871_s16 }
  0x3a   : > { %s2816_s11 = scalar_select %p2458_p0, 1, 0 }
  0x3b   : > { %p52_p1 = scmp.eq.s32.totalorder %s51_s19, 0  ;;  %p2465_p8 = por %p477_p11, %p67_p3 }
  0x3c   : > { %2817 = sst [smem:[#allocation26_spill]] %s2816_s11  ;;  %s1727_s8 = sshll.u32 %s2225_s30, 3 }
  0x3d   : > { %s2818_s15 = scalar_select %p2465_p8, 1, 0 }
  0x3e   : > { %s2470_s9 = scalar_select %p52_p1, %s2209_s26, %s54_s12  }
  0x3f   : > { %2819 = sst [smem:[#allocation27_spill]] %s2818_s15  ;;  %s507_s3 = scalar_lea.vmem [#allocation4], %s1726_s24 }
  0x40   : > { %2820 = sst [smem:[#allocation28_spill]] %s2470_s9  ;;  %s515_s21 = sshll.u32 %s507_s3, 4  ;;  %s516_s21 = int_to_ptr.vmem [resolvable:$true] %s515_s21 }
  0x41   : > { %s2821_s4 = sld [smem:[#allocation31_spill]]  ;;  %p2822_p2 = scmp.lt.s32.totalorder %s2229_s0, 4 }
  0x42   : > { %s2823_s2 = sld [smem:[#allocation33_spill]]  ;;  %s2824_s9 = sand.u32 1, %s2197_s23  }
  0x43   : > { %p1868_p13 = pnand %p2822_p2, %p2446_p6  ;;  %s542_s30 = scalar_lea.vmem [#allocation9], %s2824_s9 }
  0x44   : > { %s549_s26 = sshll.u32 %s542_s30, 4  ;;  %s504_s5 = scalar_lea.sflag [#allocation5], %s503_s1  ;;  %s550_s26 = int_to_ptr.vmem [resolvable:$true] %s549_s26 }
  0x47   : > { %s511_s11 = scalar_lea.hbm %s2821_s4, %s1727_s8  ;;  %636 = sbr.rel (%p2429_p12) target bundleno = 2323 (0x913), region = 84 }
  0x48   : > { %s513_s7 = sshll.u32 %s511_s11, 4  ;;  %s545_s12 = scalar_lea.hbm %s2823_s2, %s2221_s29  ;;  %s514_s7 = int_to_ptr.hbm [resolvable:$true] %s513_s7 }
  0x49   : > { %s547_s15 = sshll.u32 %s545_s12, 4  ;;  %s548_s15 = int_to_ptr.hbm [resolvable:$true] %s547_s15 }
  0x4a   : > { %1870 = dma.hbm_to_vmem [thread:$0]  (!%p1868_p13), %s514_s7, 128, %s516_s21, %s504_s5  }
  0x4b   : > { %1876 = dma.hbm_to_vmem [thread:$0]  (!%p2418_p9), %s548_s15, 16, %s550_s26, %s2424_s13  }
  0x4c   : > { %s2492_s3 = sand.u32 1, %s2205_s25  }
  0x4d   : > { %2825 = sst [smem:[#allocation29_spill]] %s2492_s3  ;;  %s1729_s4 = sshll.u32 %s2492_s3, 3 }
  0x4e   : > { %s639_s6 = scalar_lea.sflag [#allocation5], %s2492_s3  ;;  %s642_s8 = scalar_lea.vmem [#allocation4], %s1729_s4 }
  0x4f   : > { %2176 = dma.done.wait (%p2452_p10), %s639_s6, 128  }
  0x50   : > { %2178 = vsyncadd (%p2452_p10), %s639_s6, 4294967168  ;;  %s648_s1 = sand.u32 1, %s2377_s17   ;;  %s650_s7 = sand.u32 1, %s2193_s22  }
  0x51   : > { %s649_s9 = scalar_lea.sflag [#allocation8], %s648_s1  ;;  %s2502_s15 = scalar_lea.vmem [#allocation7], %s650_s7 }
  0x52   : > { %2180 = dma.done.wait (%p2400_p7), %s649_s9, 32  }
  0x53   : > { %2182 = vsyncadd (%p2400_p7), %s649_s9, 4294967264  ;;  %p763_p9 = scmp.lt.s32.totalorder %s2213_s27, 1  ;;  %s2827_s16 = sld [smem:[#allocation34_spill]] }
  0x54   : > { %s2828_s21 = sld [smem:[#allocation35_spill]]  ;;  %s2566_s13 = scalar_lea.vmem [#allocation10], %s1729_s4 }
  0x55   : > { %s2510_s24 = scalar_select %p763_p9, %s2213_s27, 1 }
  0x56   : > { %s2829_s6 = sld [smem:[#allocation36_spill]]  ;;  %p1743_p7 = scmp.ne.s32.totalorder %s2213_s27, 0 }
  0x57   : > { %s1835_s26 = sshll.u32 %s2510_s24, 4  ;;  %s2830_s29 = sld [smem:[#allocation37_spill]] }
  0x58   : > { %s2833_s25 = sld [smem:[#allocation40_spill]]  ;;  %s1840_s2 = sshll.u32 %s2510_s24, 6 }
  0x59   : > { %s2520_s14 = scalar_lea.vmem %s2827_s16, %s1835_s26  ;;  %s2834_s23 = sld [smem:[#allocation41_spill]] }
  0x5a   : > { %s2525_s19 = scalar_lea.vmem %s2828_s21, %s1835_s26  ;;  %s2836_s3 = sld [smem:[#allocation44_spill]] }
  0x5b   : > { %s2837_s18 = sld [smem:[#allocation43_spill]] }
  0x5c   : > { %s2530_s1 = scalar_lea.vmem %s2829_s6, %s1835_s26  ;;  %s2835_s6 = sld [smem:[#allocation42_spill]] }
  0x5d   : > { %s2535_s30 = scalar_lea.vmem %s2830_s29, %s1835_s26 }
  0x5e   : > { %2831 = sst [smem:[#allocation30_spill]] %s2535_s30  ;;  %s791_s10 = scalar_lea.vmem %s2833_s25, %s2510_s24 }
  0x5f   : > { %s2548_s22 = scalar_lea.vmem %s2834_s23, %s1835_s26  ;;  %s2564_s25 = scalar_lea.vmem [#allocation9], %s650_s7 }
  0x60   : > { %s807_s30 = scalar_lea.vmem %s2836_s3, %s2510_s24  ;;  %812 = sbr.rel (%p1743_p7) target bundleno = 103 (0x67), region = 100 }
  0x61   : > { %s2562_s28 = scalar_lea.vmem %s2837_s18, %s1840_s2 }
  0x62   : > { %s799_s0 = scalar_lea.vmem %s2835_s6, %s2510_s24 }
  0x65   : > { %v813_v0 = vld [vmem:[%s642_s8] sm:$0xff]  ;;  %vm814_vm0 = vcmask 261120  }
  0x66   : > { %815 = vst.msk [vmem:[#allocation2] sm:$0xff] %vm814_vm0, %v813_v0 }
  0x67 PF: > { %vm819_vm1 = vcmask 261120   ;;  %v2231_v3 = vmov 32.0   ;;  %v1842_v15 = vld [vmem:[%s2520_s14 + $0x8] sm:$0xff]  ;;  %v1841_v17 = vld [vmem:[%s2520_s14] sm:$0xff]  ;;  %vm951_vm6 = vcmask 64512   ;;  %s2232_s23 = smov 112  }
  0x68   : > { %1985 = vrcp.f32 %v2231_v3  ;;  %v1844_v16 = vld [vmem:[%s2525_s19 + $0x8] sm:$0xff]  ;;  %883 = vmatpush.bf16.msra.mxu0 %v1842_v15  ;;  %v1843_v18 = vld [vmem:[%s2525_s19] sm:$0xff]  ;;  %s2233_s3 = smov 120   ;;  %s2234_s4 = smov 104   ;;  %vm986_vm7 = vcmask 1043456   ;;  %vm1073_vm8 = vcmask 130112  }
  0x69   : > { %912 = vmatpush.bf16.msra.mxu2 %v1844_v16  ;;  %v1846_v19 = vld [vmem:[%s2530_s1 + $0x8] sm:$0xff]  ;;  %v1845_v22 = vld [vmem:[%s2530_s1] sm:$0xff]  ;;  %s2235_s8 = smov 8   ;;  %s2838_s7 = sld [smem:[#allocation30_spill]]  ;;  %vm1135_vm9 = vcmask 195712   ;;  %vm1197_vm10 = vcmask 261312  }
  0x6a   : > { %v1978_v30 = vld [vmem:[%s2502_s15] ss:$0 sm:$0xff]  ;;  %s2236_s15 = smov 16   ;;  %s2237_s26 = smov 24  }
  0x6b   : > { %v1979_v33 = vld [vmem:[%s2564_s25] ss:$0 sm:$0xff]  ;;  %s2839_s1 = sld [smem:[#allocation38_spill]]  ;;  %p1830_p12 = scmp.ne.s32.totalorder %s2213_s27, 1 }
  0x6c   : > { %884 = vmatpush.bf16.msra.mxu0 %v1841_v17  ;;  %s2841_s21 = sld [smem:[#allocation39_spill]] }
  0x6d   : > { %v2569_v1 = vld [vmem:[#allocation2] sm:$0xff]  ;;  %913 = vmatpush.bf16.msra.mxu2 %v1843_v18  ;;  %s2847_s25 = sld [smem:[#allocation46_spill]] (!%p1830_p12) }
  0x6e   : > { %v820_v2 = vsel %vm819_vm1, %v2569_v1, 0.0  ;;  %v1986_v4 = vpop.eup %1985 }
  0x6f   : > { %821 = vadd.xlane.f32.xlu0 %v820_v2  ;;  %v824_v5 = vmul.f32 32.0, %v1986_v4  ;;  %vm828_vm2 = vweird.f32 %v1986_v4 }
  0x71   : > { %v825_v6 = vsub.f32 1.0, %v824_v5  ;;  %941 = vmatpush.bf16.msrb.mxu2 %v1846_v19  ;;  %s2840_s16 = scalar_lea.vmem %s2839_s1, %s2510_s24 }
  0x72   : > { %s2842_s12 = scalar_lea.vmem %s2841_s21, %s2510_s24 }
  0x73   : > { %v826_v7 = vmul.f32 %v1986_v4, %v825_v6 }
  0x75   : > { %v827_v8 = vadd.f32 %v1986_v4, %v826_v7  ;;  %942 = vmatpush.bf16.msrb.mxu2 %v1845_v22 }
  0x77   : > { %v2573_v9 = vsel %vm828_vm2, %v1986_v4, %v827_v8 }
  0xe2   : > { %v822_v10 = vpop.xlane.xlu0 %821 }
  0xe3   : > { %v830_v11 = vmul.f32 %v2573_v9, %v822_v10 }
  0xe5   : > { %v831_v12 = vsub.f32 %v2569_v1, %v830_v11 }
  0xe7   : > { %v832_v13 = vmul.f32 %v831_v12, %v831_v12 }
  0xe9   : > { %v833_v14 = vsel %vm819_vm1, %v832_v13, 0.0 }
  0xea   : > { %834 = vadd.xlane.f32.xlu0 %v833_v14 }
 0x15d   : > { %v835_v20 = vpop.xlane.xlu0 %834 }
 0x15e   : > { %v836_v21 = vmul.f32 %v835_v20, %v2573_v9 }
 0x160   : > { %v837_v23 = vadd.f32 1e-05, %v836_v21 }
 0x162   : > { %1987 = vrsqrt.f32 %v837_v23  ;;  %vm844_vm4 = vweird.f32 %v837_v23 }
 0x168   : > { %v1988_v24 = vpop.eup %1987 }
 0x169   : > { %v839_v25 = vmul.f32 %v1988_v24, %v837_v23  ;;  %vm845_vm3 = vweird.f32 %v1988_v24 }
 0x16a   : > { %vm846_vm5 = vmor %vm844_vm4, %vm845_vm3 }
 0x16b   : > { %v840_v26 = vmul.f32 %v1988_v24, %v839_v25 }
 0x16d   : > { %v841_v27 = vmul.f32 0.5, %v840_v26 }
 0x16f   : > { %v842_v28 = vsub.f32 1.5, %v841_v27 }
 0x171   : > { %v843_v29 = vmul.f32 %v1988_v24, %v842_v28 }
 0x173   : > { %v847_v31 = vsel %vm846_vm5, %v1988_v24, %v843_v29 }
 0x174   : > { %v848_v32 = vmul.f32 %v847_v31, %v831_v12 }
 0x176   : > { %v852_v34 = vmul.f32 %v1978_v30, %v848_v32 }
 0x178   : > { %v856_v35 = vadd.f32 %v1979_v33, %v852_v34 }
 0x17a   : > { %v857_v36 = vpack.c.bf16 %v856_v35, %v856_v35 }
 0x17c   : > { %1752 = vmatmul.msk.bf16.vlgmr.msra.gmra.mxu0 %vm819_vm1, %v857_v36  ;;  %1761 = vmatmul.msk.bf16.vlgmr.msra.gmra.mxu2 %vm819_vm1, %v857_v36 }
 0x18c   : > { %1770 = vmatmul.msk.bf16.vlgmr.msrb.gmra.mxu2 %vm819_vm1, %v857_v36 }
 0x1f9   : > { %v886_v37 = vpop.f32.mrf.mxu0 }
 0x1fa   : > { %v948_v38 = vpack.c.bf16 %v886_v37, %v886_v37 }
 0x1fc   : > { %v1005_v39 = vunpack.c.l.b16 %v948_v38 }
 0x1fe   : > { %v1006_v40 = vpack.c.b16 %v1005_v39, %v1005_v39 }
 0x1ff   : > { %v915_v41 = vpop.f32.mrf.mxu2 }
 0x200   : > { %v949_v42 = vpack.c.bf16 %v915_v41, %v915_v41  ;;  %1075 = vrot.lane.b32.xlu0 %v1006_v40, %s2232_s23 }
 0x201   : > { %v888_v43 = vpop.f32.mrf.mxu0 }
 0x202   : > { %v1010_v44 = vunpack.c.l.b16 %v949_v42  ;;  %v956_v45 = vsel %vm951_vm6, %v949_v42, 0 }
 0x203   : > { %965 = vmatpush.bf16.xpose.msra.mxu3 %v956_v45 }
 0x204   : > { %v1011_v46 = vpack.c.b16 %v1010_v44, %v1010_v44 }
 0x206   : > { %1077 = vrot.lane.b32.xlu2 %v1011_v46, %s2232_s23  ;;  %1012 = vrot.lane.b32.xlu1 %v1011_v46, %s2233_s3 }
 0x207   : > { %v917_v47 = vpop.f32.mrf.mxu2 }
 0x20a   : > { %1771 = vmatmul.msk.bf16.vlgmr.msra.gmra.mxu3 %vm951_vm6, %v948_v38 }
 0x20e   : > { %1139 = vrot.lane.b32.xlu2 %v1011_v46, %s2234_s4  ;;  %1007 = vrot.lane.b32.xlu1 %v1006_v40, %s2233_s3 }
 0x20f   : > { %v944_v48 = vpop.f32.mrf.mxu2 }
 0x210   : > { %v2597_v49 = vpack.c.bf16 %v944_v48, %v944_v48 }
 0x212   : > { %v988_v50 = vsel %vm986_vm7, %v2597_v49, 0  ;;  %v1046_v35 = vunpack.c.l.b16 %v2597_v49 }
 0x213   : > { %997 = vmatpush.bf16.msrb.mxu0 %v988_v50 }
 0x214   : > { %v1047_v36 = vpack.c.b16 %v1046_v35, %v1046_v35 }
 0x216   : > { %1137 = vrot.lane.b32.xlu1 %v1006_v40, %s2234_s4 }
 0x217   : > { %v946_v51 = vpop.f32.mrf.mxu2 }
 0x260   : > { %v1078_v52 = vpop.permute.xlu2 %1077 }
 0x261   : > { %v1083_v53 = vsel %vm951_vm6, %v1078_v52, 0 }
 0x262   : > { %1092 = vmatpush.bf16.xpose.msrb.mxu3 %v1083_v53 }
 0x268   : > { %v1140_v55 = vpop.permute.xlu2 %1139 }
 0x269   : > { %v1145_v58 = vsel %vm951_vm6, %v1140_v55, 0 }
 0x272   : > { %v1076_v54 = vpop.permute.xlu0 %1075 }
 0x273   : > { %1775 = vmatmul.msk.bf16.vlgmr.msrb.gmra.mxu3 %vm951_vm6, %v1076_v54 }
 0x278   : > { %v1013_v56 = vpop.permute.xlu1 %1012 }
 0x279   : > { %v1018_v57 = vsel %vm951_vm6, %v1013_v56, 0 }
 0x27a   : > { %1027 = vmatpush.bf16.xpose.msra.mxu1 %v1018_v57 }
 0x280   : > { %v1008_v59 = vpop.permute.xlu1 %1007 }
 0x281   : > { %1773 = vmatmul.msk.bf16.vlgmr.msra.gmra.mxu1 %vm951_vm6, %v1008_v59 }
 0x282   : > { %1154 = vmatpush.bf16.xpose.msrb.mxu1 %v1145_v58 }
 0x288   : > { %v1138_v62 = vpop.permute.xlu1 %1137 }
 0x28d   : > { %v967_v60 = vpop.f32.mrf.mxu3 }
 0x28e   : > { %v971_v61 = vsel %vm951_vm6, %v967_v60, -inf }
 0x28f   : > { %972 = vmax.xlane.f32.xlu1 %v971_v61 }
 0x291   : > { %1777 = vmatmul.msk.bf16.vlgmr.msrb.gmra.mxu1 %vm951_vm6, %v1138_v62 }
 0x295   : > { %v969_v63 = vpop.f32.mrf.mxu3 }
 0x2f6   : > { %v1094_v0 = vpop.f32.mrf.mxu3 }
 0x2f7   : > { %v1098_v10 = vsel %vm951_vm6, %v1094_v0, -inf }
 0x2fe   : > { %v1029_v2 = vpop.f32.mrf.mxu1  ;;  %v1096_v3 = vpop.f32.mrf.mxu3 }
 0x2ff   : > { %v1033_v4 = vsel %vm951_vm6, %v1029_v2, -inf  ;;  %v1847_v3 = vld [vmem:[%s2838_s7] sm:$0xff] }
 0x300   : > { %1034 = vmax.xlane.f32.xlu2 %v1033_v4 }
 0x302   : > { %v973_v5 = vpop.xlane.xlu1 %972 }
 0x303   : > { %v974_v6 = vsub.f32 %v967_v60, %v973_v5 }
 0x305   : > { %v975_v7 = vmul.f32 1.442695, %v974_v6 }
 0x306   : > { %v1031_v8 = vpop.f32.mrf.mxu1 }
 0x307   : > { %1989 = vpow2.f32 %v975_v7  ;;  %v1980_v7 = vld [vmem:[%s2840_s16] ss:$0 sm:$0xff] }
 0x308   : > { %1099 = vmax.xlane.f32.xlu2 %v1098_v10  ;;  %v1203_v8 = vadd.f32 %v1980_v7, %v2569_v1  ;;  %v1849_v1 = vld [vmem:[%s2548_s22] sm:$0xff] }
 0x30d   : > { %v1990_v11 = vpop.eup %1989 }
 0x30e   : > { %v1156_v12 = vpop.f32.mrf.mxu1  ;;  %v977_v13 = vsel %vm951_vm6, %v1990_v11, 0.0 }
 0x30f   : > { %978 = vadd.xlane.f32.xlu1 %v977_v13  ;;  %v1160_v14 = vsel %vm951_vm6, %v1156_v12, -inf }
 0x310   : > { %1161 = vmax.xlane.f32.xlu0 %v1160_v14 }
 0x316   : > { %v1158_v15 = vpop.f32.mrf.mxu1 }
 0x373   : > { %v1035_v16 = vpop.xlane.xlu2 %1034 }
 0x374   : > { %v1036_v17 = vsub.f32 %v1029_v2, %v1035_v16  ;;  %v1848_v2 = vld [vmem:[%s2838_s7 + $0x8] sm:$0xff] }
 0x375   : > { %1231 = vmatpush.bf16.msra.mxu3 %v1848_v2 }
 0x376   : > { %v1037_v18 = vmul.f32 1.442695, %v1036_v17 }
 0x378   : > { %1991 = vpow2.f32 %v1037_v18 }
 0x379   : > { %1232 = vmatpush.bf16.msra.mxu3 %v1847_v3 }
 0x37b   : > { %v1100_v19 = vpop.xlane.xlu2 %1099 }
 0x37c   : > { %v1101_v20 = vsub.f32 %v1094_v0, %v1100_v19  ;;  %v1850_v19 = vld [vmem:[%s2548_s22 + $0x8] sm:$0xff] }
 0x37e   : > { %v1992_v21 = vpop.eup %1991  ;;  %v1102_v22 = vmul.f32 1.442695, %v1101_v20 }
 0x37f   : > { %v1039_v23 = vsel %vm951_vm6, %v1992_v21, 0.0 }
 0x380   : > { %1993 = vpow2.f32 %v1102_v22  ;;  %1040 = vadd.xlane.f32.xlu2 %v1039_v23 }
 0x382   : > { %v979_v24 = vpop.xlane.xlu1 %978 }
 0x383   : > { %1995 = vrcp.f32 %v979_v24  ;;  %v1162_v25 = vpop.xlane.xlu0 %1161 }
 0x384   : > { %v1163_v26 = vsub.f32 %v1156_v12, %v1162_v25 }
 0x386   : > { %v1994_v27 = vpop.eup %1993  ;;  %v1164_v28 = vmul.f32 1.442695, %v1163_v26 }
 0x387   : > { %v1104_v29 = vsel %vm951_vm6, %v1994_v27, 0.0 }
 0x388   : > { %1997 = vpow2.f32 %v1164_v28  ;;  %1105 = vadd.xlane.f32.xlu0 %v1104_v29  ;;  %v1981_v29 = vld [vmem:[%s2842_s12] ss:$0 sm:$0xff] }
 0x389   : > { %v1996_v30 = vpop.eup %1995 }
 0x38a   : > { %v981_v31 = vmul.f32 %v1996_v30, %v1990_v11 }
 0x38c   : > { %v982_v32 = vpack.c.bf16 %v981_v31, %v981_v31 }
 0x38e   : > { %v1998_v33 = vpop.eup %1997  ;;  %1772 = vmatmul.msk.bf16.vlgmr.msrb.gmra.mxu0 %vm951_vm6, %v982_v32  ;;  %v1982_v32 = vld [vmem:[%s791_s10] ss:$0 sm:$0xff] }
 0x38f   : > { %v1166_v34 = vsel %vm951_vm6, %v1998_v33, 0.0 }
 0x390   : > { %1167 = vadd.xlane.f32.xlu1 %v1166_v34 }
 0x398   : > { %1048 = vrot.lane.b32.xlu2 %v1047_v36, %s2233_s3 }
 0x39c   : > { %1110 = vrot.lane.b32.xlu0 %v1047_v36, %s2232_s23 }
 0x3a9   : > { %1172 = vrot.lane.b32.xlu1 %v1047_v36, %s2234_s4  ;;  %v1858_v36 = vld [vmem:[%s2562_s28 + $0x38] sm:$0xff] }
 0x3aa   : > { %1421 = vmatpush.bf16.msra.mxu1 %v1858_v36 }
 0x3f3   : > { %v1041_v37 = vpop.xlane.xlu2 %1040 }
 0x3f4   : > { %1999 = vrcp.f32 %v1041_v37  ;;  %v1857_v37 = vld [vmem:[%s2562_s28 + $0x30] sm:$0xff] }
 0x3f5   : > { %1422 = vmatpush.bf16.msra.mxu1 %v1857_v37 }
 0x3fa   : > { %v2000_v38 = vpop.eup %1999 }
 0x3fb   : > { %v1043_v39 = vmul.f32 %v2000_v38, %v1992_v21  ;;  %v1049_v40 = vpop.permute.xlu2 %1048  ;;  %v1106_v43 = vpop.xlane.xlu0 %1105  ;;  %v1983_v38 = vld [vmem:[%s799_s0] ss:$0 sm:$0xff] }
 0x3fc   : > { %v1054_v41 = vsel %vm986_vm7, %v1049_v40, 0  ;;  %2001 = vrcp.f32 %v1106_v43  ;;  %v1856_v40 = vld [vmem:[%s2562_s28 + $0x28] sm:$0xff]  ;;  %v1855_v43 = vld [vmem:[%s2562_s28 + $0x20] sm:$0xff] }
 0x3fd   : > { %v1044_v42 = vpack.c.bf16 %v1043_v39, %v1043_v39  ;;  %1063 = vmatpush.bf16.msra.mxu2 %v1054_v41  ;;  %1423 = vmatpush.bf16.msra.mxu1 %v1856_v40 }
 0x400   : > { %1774 = vmatmul.msk.bf16.vlgmr.msra.gmra.mxu2 %vm951_vm6, %v1044_v42 }
 0x401   : > { %1424 = vmatpush.bf16.msra.mxu1 %v1855_v43 }
 0x402   : > { %v2002_v44 = vpop.eup %2001 }
 0x403   : > { %v1108_v46 = vmul.f32 %v2002_v44, %v1994_v27  ;;  %v1168_v47 = vpop.xlane.xlu1 %1167 }
 0x404   : > { %2003 = vrcp.f32 %v1168_v47  ;;  %v1854_v47 = vld [vmem:[%s2562_s28 + $0x18] sm:$0xff] }
 0x405   : > { %v1109_v50 = vpack.c.bf16 %v1108_v46, %v1108_v46  ;;  %1425 = vmatpush.bf16.msra.mxu1 %v1854_v47 }
 0x40a   : > { %v2004_v52 = vpop.eup %2003 }
 0x40b   : > { %v999_v45 = vpop.f32.mrf.mxu0  ;;  %v1170_v53 = vmul.f32 %v2004_v52, %v1998_v33  ;;  %v1853_v52 = vld [vmem:[%s2562_s28 + $0x10] sm:$0xff] }
 0x40c   : > { %1003 = vst.msk [vmem:[#allocation3] sm:$0xff] %vm951_vm6, %v999_v45  ;;  %1426 = vmatpush.bf16.msra.mxu1 %v1853_v52 }
 0x40d   : > { %v1171_v56 = vpack.c.bf16 %v1170_v53, %v1170_v53 }
 0x40e   : > { %v1111_v48 = vpop.permute.xlu0 %1110 }
 0x40f   : > { %v1116_v49 = vsel %vm986_vm7, %v1111_v48, 0 }
 0x410   : > { %1125 = vmatpush.bf16.msra.mxu0 %v1116_v49 }
 0x413   : > { %v1001_v51 = vpop.f32.mrf.mxu0  ;;  %1776 = vmatmul.msk.bf16.vlgmr.msra.gmra.mxu0 %vm951_vm6, %v1109_v50 }
 0x414   : > { %1301 = vmatpush.bf16.msrb.mxu0 %v1850_v19 }
 0x418   : > { %1302 = vmatpush.bf16.msrb.mxu0 %v1849_v1 }
 0x41b   : > { %v1173_v54 = vpop.permute.xlu1 %1172 }
 0x41c   : > { %v1178_v55 = vsel %vm986_vm7, %v1173_v54, 0 }
 0x41d   : > { %1187 = vmatpush.bf16.msrb.mxu2 %v1178_v55 }
 0x420   : > { %1778 = vmatmul.msk.bf16.vlgmr.msrb.gmra.mxu2 %vm951_vm6, %v1171_v56 }
 0x483   : > { %v1065_v57 = vpop.f32.mrf.mxu2 }
 0x484   : > { %1070 = vrot.lane.b32.xlu2 %v1065_v57, %s2235_s8  ;;  %v1852_v57 = vld [vmem:[%s2562_s28 + $0x8] sm:$0xff] }
 0x485   : > { %1427 = vmatpush.bf16.msra.mxu1 %v1852_v57 }
 0x48b   : > { %v1067_v58 = vpop.f32.mrf.mxu2 }
 0x490   : > { %v1127_v59 = vpop.f32.mrf.mxu0 }
 0x491   : > { %1132 = vrot.lane.b32.xlu2 %v1127_v59, %s2236_s15 }
 0x498   : > { %v1129_v60 = vpop.f32.mrf.mxu0 }
 0x4a3   : > { %v1189_v61 = vpop.f32.mrf.mxu2 }
 0x4a4   : > { %1194 = vrot.lane.b32.xlu0 %v1189_v61, %s2237_s26  ;;  %v1851_v61 = vld [vmem:[%s2562_s28] sm:$0xff] }
 0x4a5   : > { %1428 = vmatpush.bf16.msra.mxu1 %v1851_v61 }
 0x4ab   : > { %v1191_v62 = vpop.f32.mrf.mxu2 }
 0x4de   : > { %v1071_v63 = vpop.permute.xlu2 %1070 }
 0x4df   : > { %1074 = vst.msk [vmem:[#allocation3] sm:$0xff] %vm1073_vm8, %v1071_v63 }
 0x4eb   : > { %v1133_v0 = vpop.permute.xlu2 %1132 }
 0x4ec   : > { %1136 = vst.msk [vmem:[#allocation3] sm:$0xff] %vm1135_vm9, %v1133_v0 }
 0x516   : > { %v1195_v4 = vpop.permute.xlu0 %1194 }
 0x517   : > { %1198 = vst.msk [vmem:[#allocation3] sm:$0xff] %vm1197_vm10, %v1195_v4 }
 0x51e   : > { %v1204_v5 = vld [vmem:[#allocation3] sm:$0xff] }
 0x51f   : > { %v1205_v6 = vpack.c.bf16 %v1204_v5, %v1204_v5 }
 0x521   : > { %1787 = vmatmul.msk.bf16.vlgmr.msra.gmra.mxu3 %vm819_vm1, %v1205_v6 }
 0x5a4   : > { %v1234_v10 = vpop.f32.mrf.mxu3 }
 0x5a5   : > { %v2637_v11 = vadd.f32 %v1234_v10, %v1203_v8 }
 0x5a7   : > { %v1241_v12 = vsel %vm819_vm1, %v2637_v11, 0.0 }
 0x5a8   : > { %1242 = vadd.xlane.f32.xlu1 %v1241_v12 }
 0x5ac   : > { %v1236_v13 = vpop.f32.mrf.mxu3 }
 0x61b   : > { %v1243_v14 = vpop.xlane.xlu1 %1242 }
 0x61c   : > { %v1244_v15 = vmul.f32 %v1243_v14, %v2573_v9 }
 0x61e   : > { %v1245_v16 = vsub.f32 %v2637_v11, %v1244_v15 }
 0x620   : > { %v1246_v17 = vmul.f32 %v1245_v16, %v1245_v16 }
 0x622   : > { %v1247_v18 = vsel %vm819_vm1, %v1246_v17, 0.0 }
 0x623   : > { %1248 = vadd.xlane.f32.xlu2 %v1247_v18 }
 0x696   : > { %v1249_v20 = vpop.xlane.xlu2 %1248 }
 0x697   : > { %v1250_v21 = vmul.f32 %v1249_v20, %v2573_v9 }
 0x699   : > { %v1251_v22 = vadd.f32 1e-05, %v1250_v21 }
 0x69b   : > { %2005 = vrsqrt.f32 %v1251_v22  ;;  %vm1258_vm12 = vweird.f32 %v1251_v22 }
 0x6a1   : > { %v2006_v23 = vpop.eup %2005 }
 0x6a2   : > { %v1253_v24 = vmul.f32 %v2006_v23, %v1251_v22  ;;  %vm1259_vm11 = vweird.f32 %v2006_v23 }
 0x6a3   : > { %vm1260_vm13 = vmor %vm1258_vm12, %vm1259_vm11 }
 0x6a4   : > { %v1254_v25 = vmul.f32 %v2006_v23, %v1253_v24 }
 0x6a6   : > { %v1255_v26 = vmul.f32 0.5, %v1254_v25 }
 0x6a8   : > { %v1256_v27 = vsub.f32 1.5, %v1255_v26  ;;  %v1984_v26 = vld [vmem:[%s807_s30] ss:$0 sm:$0xff]  ;;  %s2846_s30 = sld [smem:[#allocation45_spill]] (!%p1830_p12) }
 0x6aa   : > { %v1257_v28 = vmul.f32 %v2006_v23, %v1256_v27 }
 0x6ac   : > { %v1261_v30 = vsel %vm1260_vm13, %v2006_v23, %v1257_v28 }
 0x6ad   : > { %v1262_v31 = vmul.f32 %v1261_v30, %v1245_v16 }
 0x6af   : > { %v1266_v33 = vmul.f32 %v1981_v29, %v1262_v31 }
 0x6b1   : > { %v1270_v34 = vadd.f32 %v1982_v32, %v1266_v33 }
 0x6b3   : > { %v1271_v35 = vpack.c.bf16 %v1270_v34, %v1270_v34 }
 0x6b5   : > { %1796 = vmatmul.msk.bf16.vlgmr.msrb.gmra.mxu0 %vm819_vm1, %v1271_v35 }
 0x732   : > { %v1304_v39 = vpop.f32.mrf.mxu0 }
 0x733   : > { %v1305_v41 = vadd.f32 %v1983_v38, %v1304_v39 }
 0x735   : > { %v1309_v42 = vmul.f32 0.70710677, %v1305_v41  ;;  %v1308_v22 = vmul.f32 0.5, %v1305_v41 }
 0x737   : > { %v1310_v44 = vmul.f32 %v1309_v42, %v1309_v42 }
 0x739   : > { %v1311_v45 = vmin.f32 %v1310_v44, 16.0 }
 0x73a   : > { %v1306_v46 = vpop.f32.mrf.mxu0 }
 0x73b   : > { %v1312_v48 = vmul.f32 2.1237322e-06, %v1311_v45  ;;  %v1323_v49 = vmul.f32 3.8918573e-05, %v1311_v45 }
 0x73d   : > { %v1313_v50 = vadd.f32 0.00028619796, %v1312_v48  ;;  %v1324_v51 = vadd.f32 0.001143296, %v1323_v49 }
 0x73f   : > { %v1314_v53 = vmul.f32 %v1313_v50, %v1311_v45  ;;  %v1325_v54 = vmul.f32 %v1324_v51, %v1311_v45 }
 0x741   : > { %v1326_v55 = vadd.f32 0.014752088, %v1325_v54  ;;  %v1315_v56 = vadd.f32 0.0036580483, %v1314_v53 }
 0x743   : > { %v1327_v58 = vmul.f32 %v1326_v55, %v1311_v45  ;;  %v1316_v60 = vmul.f32 %v1315_v56, %v1311_v45 }
 0x745   : > { %v1328_v59 = vadd.f32 0.112945676, %v1327_v58  ;;  %v1317_v0 = vadd.f32 0.05243302, %v1316_v60 }
 0x747   : > { %v1329_v62 = vmul.f32 %v1328_v59, %v1311_v45  ;;  %v1318_v4 = vmul.f32 %v1317_v0, %v1311_v45 }
 0x749   : > { %v1330_v63 = vadd.f32 0.4994258, %v1329_v62  ;;  %v1319_v5 = vadd.f32 0.18741608, %v1318_v4 }
 0x74b   : > { %v1331_v2 = vmul.f32 %v1330_v63, %v1311_v45  ;;  %v1320_v7 = vmul.f32 %v1319_v5, %v1311_v45 }
 0x74d   : > { %v1332_v3 = vadd.f32 1.0, %v1331_v2  ;;  %v1321_v13 = vadd.f32 1.1283791, %v1320_v7 }
 0x74f   : > { %2007 = vrcp.f32 %v1332_v3  ;;  %v1344_v12 = vand.u32 2147483648, %v1332_v3  ;;  %v1342_v15 = vand.u32 2147483647, %v1332_v3  ;;  %vm1338_vm15 = vweird.f32 %v1332_v3 }
 0x750   : > { %v1322_v18 = vmul.f32 %v1321_v13, %v1309_v42 }
 0x751   : > { %v1345_v17 = vor.u32 1.1754944e-38, %v1344_v12  ;;  %vm1343_vm2 = vcmp.eq.f32.partialorder %v1342_v15, 8.507059e+37 }
 0x755   : > { %v2008_v6 = vpop.eup %2007 }
 0x756   : > { %v1334_v8 = vmul.f32 %v2008_v6, %v1332_v3  ;;  %vm1339_vm14 = vweird.f32 %v2008_v6 }
 0x757   : > { %vm1340_vm0 = vmor %vm1338_vm15, %vm1339_vm14 }
 0x758   : > { %v1335_v10 = vsub.f32 1.0, %v1334_v8 }
 0x75a   : > { %v1336_v14 = vmul.f32 %v2008_v6, %v1335_v10 }
 0x75c   : > { %v1337_v16 = vadd.f32 %v2008_v6, %v1336_v14 }
 0x75e   : > { %v1341_v19 = vsel %vm1340_vm0, %v2008_v6, %v1337_v16 }
 0x75f   : > { %v1346_v1 = vsel %vm1343_vm2, %v1345_v17, %v1341_v19 }
 0x760   : > { %v1347_v20 = vmul.f32 %v1346_v1, %v1322_v18 }
 0x762   : > { %v1797_v21 = vclamps-f32 %v1347_v20, 1.0 }
 0x764   : > { %v1350_v23 = vadd.f32 1.0, %v1797_v21 }
 0x766   : > { %v1351_v24 = vmul.f32 %v1350_v23, %v1308_v22 }
 0x768   : > { %v1352_v25 = vpack.c.bf16 %v1351_v24, %v1351_v24 }
 0x76a   : > { %1429 = vmatmul.bf16.vlgmr.msra.gmra.mxu1 %v1352_v25 }
 0x7e7   : > { %v1430_v27 = vpop.f32.mrf.mxu1 }
 0x7e8   : > { %v1431_v28 = vadd.f32 %v1984_v26, %v1430_v27 }
 0x7ea   : > { %v1434_v29 = vadd.f32 %v1431_v28, %v2637_v11 }
 0x7eb   : > { %1439 = sbr.rel (%p1830_p12) target bundleno = 2301 (0x8fd), region = 104 }
 0x7ec   : > { %1435 = vst.msk [vmem:[#allocation2] sm:$0xff] %vm819_vm1, %v1434_v29 }
 0x7ef   : > { %v1432_v30 = vpop.f32.mrf.mxu1 }
 0x7f0   : > { %v1442_v31 = vsel %vm819_vm1, %v1434_v29, 0.0  ;;  %v2009_v45 = vld [vmem:[%s2846_s30] ss:$0 sm:$0xff] }
 0x7f1   : > { %1443 = vadd.xlane.f32.xlu0 %v1442_v31 }
 0x864   : > { %v1444_v32 = vpop.xlane.xlu0 %1443 }
 0x865   : > { %v1445_v33 = vmul.f32 %v1444_v32, %v2573_v9 }
 0x867   : > { %v1446_v34 = vsub.f32 %v1434_v29, %v1445_v33 }
 0x869   : > { %v1447_v35 = vmul.f32 %v1446_v34, %v1446_v34 }
 0x86b   : > { %v1448_v36 = vsel %vm819_vm1, %v1447_v35, 0.0 }
 0x86c   : > { %1449 = vadd.xlane.f32.xlu0 %v1448_v36 }
 0x8df   : > { %v1450_v37 = vpop.xlane.xlu0 %1449 }
 0x8e0   : > { %v1451_v11 = vmul.f32 %v1450_v37, %v2573_v9  ;;  %v2010_v9 = vld [vmem:[%s2847_s25] ss:$0 sm:$0xff] }
 0x8e2   : > { %v1452_v38 = vadd.f32 1e-05, %v1451_v11 }
 0x8e4   : > { %2011 = vrsqrt.f32 %v1452_v38  ;;  %vm1459_vm4 = vweird.f32 %v1452_v38 }
 0x8ea   : > { %v2012_v39 = vpop.eup %2011 }
 0x8eb   : > { %v1454_v40 = vmul.f32 %v2012_v39, %v1452_v38  ;;  %vm1460_vm3 = vweird.f32 %v2012_v39 }
 0x8ec   : > { %vm1461_vm5 = vmor %vm1459_vm4, %vm1460_vm3 }
 0x8ed   : > { %v1455_v41 = vmul.f32 %v2012_v39, %v1454_v40 }
 0x8ef   : > { %v1456_v42 = vmul.f32 0.5, %v1455_v41 }
 0x8f1   : > { %v1457_v43 = vsub.f32 1.5, %v1456_v42 }
 0x8f3   : > { %v1458_v44 = vmul.f32 %v2012_v39, %v1457_v43 }
 0x8f5   : > { %v1462_v46 = vsel %vm1461_vm5, %v2012_v39, %v1458_v44 }
 0x8f6   : > { %v1463_v47 = vmul.f32 %v1462_v46, %v1446_v34 }
 0x8f8   : > { %v1467_v48 = vmul.f32 %v2009_v45, %v1463_v47 }
 0x8fa   : > { %v1471_v49 = vadd.f32 %v2010_v9, %v1467_v48 }
 0x8fc   : > { %1472 = vst.msk [vmem:[%s2566_s13] sm:$0xff] %vm819_vm1, %v1471_v49 }
 0x8fd PF: > { %s2848_s23 = sld [smem:[#allocation19_spill]]  ;;  %s1486_s1 = sshll.u32 %s2566_s13, 4  ;;  %s1487_s1 = int_to_ptr.vmem [resolvable:$true] %s1486_s1 }
 0x8fe   : > { %s2849_s3 = sld [smem:[#allocation29_spill]] }
 0x8ff   : > { %s2851_s26 = sld [smem:[#allocation47_spill]] }
 0x903   : > { %s1832_s8 = sshll.u32 %s2848_s23, 3 }
 0x904   : > { %s1474_s11 = scalar_lea.sflag [#allocation6], %s2849_s3 }
 0x905   : > { %s2852_s14 = smov %s2851_s26  ;;  %s1484_s19 = scalar_lea.hbm %s2851_s26, %s1832_s8 }
 0x906   : > { %s1488_s16 = sshll.u32 %s1484_s19, 4  ;;  %s2123_s6 = scalar_lea.hbm %s2852_s14, 16  ;;  %s1489_s16 = int_to_ptr.hbm [resolvable:$true] %s1488_s16 }
 0x907   : > { %s2117_s22 = sshra.s32 %s1489_s16, 4  ;;  %s2118_s22 = int_to_ptr.hbm [resolvable:$true] %s2117_s22 }
 0x908   : > { %s2119_s21 = scalar_lea.hbm %s2118_s22, 8  ;;  %p2124_p6 = scmp.lt.s32.totalorder %s2118_s22, %s2852_s14 }
 0x909   : > { %p2120_p3 = scmp.ne.s32.totalorder %s2118_s22, %s2119_s21  ;;  %p2125_p10 = scmp.lt.s32.totalorder %s2123_s6, %s2119_s21 }
 0x90b   : > { %p2121_p4 = pnand %p2120_p3, %p2458_p0  ;;  %p2126_p11 = por %p2125_p10, %p2124_p6 }
 0x90d   : > { %p2122_p5 = pneg %p2121_p4 }
 0x90f   : > { %p2127_p1 = pnand %p2126_p11, %p2122_p5 }
 0x911   : > { %2130 = shalt.err (!%p2127_p1)
}
 0x912   : > { %1865 = dma.vmem_to_hbm [thread:$0]  (%p2458_p0), %s1487_s1, 128, %s1489_s16, %s1474_s11  }
 0x913 PF: > { %s2853_s13 = sld [smem:[#allocation22_spill]] }
 0x914   : > { %s2854_s9 = sld [smem:[#allocation16_spill]] }
 0x919   : > { %p1882_p2 = scmp.ge.s32.totalorder %s2853_s13, 2 }
 0x91a   : > { %s1500_s0 = sand.u32 1, %s2854_s9  }
 0x91b   : > { %p1878_p13 = pnand %p1882_p2, %p2465_p8  ;;  %s1501_s28 = scalar_lea.sflag [#allocation6], %s1500_s0 }
 0x91d   : > { %p1879_p9 = pneg %p1878_p13 }
 0x91f   : > { %2184 = dma.done.wait (%p1879_p9), %s1501_s28, 128  }
 0x920   : > { %2186 = vsyncadd (%p1879_p9), %s1501_s28, 4294967168  ;;  %s35_s0 = sadd.s32 1, %s2853_s13   ;;  %s2856_s21 = sld [smem:[#allocation14_spill]] }
 0x921   : > { %p32_p7 = scmp.ge.s32.totalorder %s35_s0, 6   ;;  %s2857_s22 = sld [smem:[#allocation15_spill]] }
 0x922   : > { %s2858_s23 = sld [smem:[#allocation24_spill]] }
 0x923   : > { %s2859_s24 = sld [smem:[#allocation17_spill]] }
 0x924   : > { %s2860_s25 = sld [smem:[#allocation18_spill]] }
 0x925   : > { %s2861_s26 = sld [smem:[#allocation28_spill]]  ;;  %34 = sbr.rel (!%p32_p7) target bundleno = 29 (0x1d), region = 194 }
 0x926   : > { %s2862_s27 = sld [smem:[#allocation20_spill]] }
 0x927   : > { %s2863_s28 = sld [smem:[#allocation21_spill]] }
 0x928   : > { %s2864_s29 = sld [smem:[#allocation23_spill]] }
 0x929   : > { %s2865_s30 = sld [smem:[#allocation25_spill]] }
 0x92a   :  { %1507 = vsyncpa [#allocation5], 1 }
 0x92b   :  { %1509 = vsyncpa [#allocation5 + $0x1], 1 }
 0x92c   :  { %1510 = vsyncpa [#allocation8], 1 }
 0x92d   :  { %1512 = vsyncpa [#allocation8 + $0x1], 1 }
 0x92e   :  { %1513 = vsyncpa [#allocation6], 1 }
 0x92f   :  { %1515 = vsyncpa [#allocation6 + $0x1], 1 }

</bundles_post_ra>
